<compile_context>
chip_gen: v5e
topology: v5e:2x2
jax: 0.10.0
libtpu: 0.0.40
codegen_flags: <defaults>
</compile_context>

<pallas_src>
import functools
import math

import jax
import jax.numpy as jnp
from jax.experimental import pallas as pl
from jax.experimental.pallas import tpu as pltpu


def _msa_flash_kernel(q_ref, k_ref, v_ref,
                      wq_ref, bq_ref, wk_ref, bk_ref, wv_ref, bv_ref,
                      wo_ref, bo_ref, o_ref,
                      qh_s, kh_s, vh_s, m_s, l_s, acc_s, xm_s,
                      *, num_heads, head_dim):
    # q_ref: (tq, E) bf16, k_ref/v_ref: (tk, E) bf16
    # wq/wk/wv_ref: (E, E) bf16 block-diagonal, (in, out) layout (scale folded
    #               into wq); wo_ref: (E, E) bf16, (in, out) layout
    # b*_ref: (1, E) f32 (scale folded into bq)
    # qh_s: (H, tq, Dh) bf16   projected q, cached across the KV loop
    # kh_s/vh_s: (H, tk, Dh) bf16
    # m_s/l_s: (H, tq, 1) f32; acc_s: (H, tq, Dh) f32; xm_s: (tq, E) bf16
    ki = pl.program_id(2)
    nk = pl.num_programs(2)

    @pl.when(ki == 0)
    def _init():
        # Project the (resident) q tile once per (b, q-tile): a single
        # lane-dense bf16 MXU matmul against the block-diagonal weights.
        qp = jnp.dot(q_ref[...], wq_ref[...],
                     preferred_element_type=jnp.float32) + bq_ref[...]
        for h in range(num_heads):
            lo = h * head_dim
            qh_s[h] = qp[:, lo:lo + head_dim].astype(jnp.bfloat16)
        m_s[...] = jnp.full(m_s.shape, -jnp.inf, dtype=jnp.float32)
        l_s[...] = jnp.zeros(l_s.shape, dtype=jnp.float32)
        acc_s[...] = jnp.zeros(acc_s.shape, dtype=jnp.float32)

    # Per-KV-tile projection (lane-dense bf16 matmuls), then ONE relayout of
    # each projected tile into the (H, tk, Dh) head-batched scratch layout.
    kp = jnp.dot(k_ref[...], wk_ref[...],
                 preferred_element_type=jnp.float32) + bk_ref[...]
    vp = jnp.dot(v_ref[...], wv_ref[...],
                 preferred_element_type=jnp.float32) + bv_ref[...]
    for h in range(num_heads):
        lo = h * head_dim
        kh_s[h] = kp[:, lo:lo + head_dim].astype(jnp.bfloat16)
        vh_s[h] = vp[:, lo:lo + head_dim].astype(jnp.bfloat16)

    # All heads' scores with a single head-batched MXU dot (scale is already
    # folded into the q projection): (H, tq, Dh) x (H, tk, Dh) -> (H, tq, tk)
    s = jnp.einsum("htd,hsd->hts", qh_s[...], kh_s[...],
                   preferred_element_type=jnp.float32)

    # Online-softmax (flash) update, all in f32 on the VPU/EUP.
    m_prev = m_s[...]
    m_new = jnp.maximum(m_prev, jnp.max(s, axis=-1, keepdims=True))
    alpha = jnp.exp(m_prev - m_new)
    p = jnp.exp(s - m_new)
    l_s[...] = alpha * l_s[...] + jnp.sum(p, axis=-1, keepdims=True)
    acc_s[...] = alpha * acc_s[...] + jnp.einsum(
        "hts,hsd->htd", p.astype(jnp.bfloat16), vh_s[...],
        preferred_element_type=jnp.float32)
    m_s[...] = m_new

    @pl.when(ki == nk - 1)
    def _finalize():
        inv_l = pl.reciprocal(l_s[...], approx=True)
        heads_out = acc_s[...] * inv_l                    # (H, tq, Dh) f32
        # Merge heads into a lane-dense (tq, E) scratch, then one output
        # projection matmul (weight pre-transposed in the wrapper).
        for h in range(num_heads):
            lo = h * head_dim
            xm_s[:, lo:lo + head_dim] = heads_out[h].astype(jnp.bfloat16)
        o_ref[...] = (jnp.dot(xm_s[...], wo_ref[...],
                              preferred_element_type=jnp.float32)
                      + bo_ref[...]).astype(o_ref.dtype)


def _choose_tile(n, target):
    """Largest tile <= target that divides n and is a multiple of 8 (or n)."""
    if n <= target:
        return n
    for t in range(min(target, n), 7, -1):
        if n % t == 0 and t % 8 == 0:
            return t
    return n  # fall back to an untiled axis (block == full dim is legal)


def msa_forward(q, k, v, params, num_heads, *, q_tile=256, kv_tile=256):
    B, Tq, E = q.shape
    Tk = k.shape[1]
    assert E % num_heads == 0
    Dh = E // num_heads
    scale = 1.0 / math.sqrt(Dh)

    tq = _choose_tile(Tq, q_tile)
    tk = _choose_tile(Tk, kv_tile)
    assert Tq % tq == 0 and Tk % tk == 0
    nq, nk = Tq // tq, Tk // tk

    # One-time weight layout prep (outside the kernel):
    #  - per-head (Dh, Dh) weights -> block-diagonal (E, E), (in, out) layout,
    #    cast to bf16 for the MXU; 1/sqrt(Dh) folded into wq and bq
    #  - biases tiled across heads, kept in f32 (added post-accumulation)
    def block_diag_t(w):
        return jax.scipy.linalg.block_diag(*([w.T] * num_heads))

    wq_bd = (block_diag_t(params["wq"]) * scale).astype(jnp.bfloat16)
    wk_bd = block_diag_t(params["wk"]).astype(jnp.bfloat16)
    wv_bd = block_diag_t(params["wv"]).astype(jnp.bfloat16)
    bq = (jnp.tile(params["bq"], num_heads) * scale).reshape(1, E)
    bk = jnp.tile(params["bk"], num_heads).reshape(1, E)
    bv = jnp.tile(params["bv"], num_heads).reshape(1, E)
    wo_t = params["wo"].T.astype(jnp.bfloat16)          # (in, out)
    bo = params["bo"].reshape(1, E)

    qb = q.astype(jnp.bfloat16)
    kb = k.astype(jnp.bfloat16)
    vb = v.astype(jnp.bfloat16)

    kernel = functools.partial(_msa_flash_kernel,
                               num_heads=num_heads, head_dim=Dh)

    out = pl.pallas_call(
        kernel,
        out_shape=jax.ShapeDtypeStruct((B, Tq, E), q.dtype),
        grid=(B, nq, nk),
        in_specs=[
            pl.BlockSpec((None, tq, E), lambda b, qi, ki: (b, qi, 0)),   # q
            pl.BlockSpec((None, tk, E), lambda b, qi, ki: (b, ki, 0)),   # k
            pl.BlockSpec((None, tk, E), lambda b, qi, ki: (b, ki, 0)),   # v
            pl.BlockSpec((E, E), lambda b, qi, ki: (0, 0)),              # wq
            pl.BlockSpec((1, E), lambda b, qi, ki: (0, 0)),              # bq
            pl.BlockSpec((E, E), lambda b, qi, ki: (0, 0)),              # wk
            pl.BlockSpec((1, E), lambda b, qi, ki: (0, 0)),              # bk
            pl.BlockSpec((E, E), lambda b, qi, ki: (0, 0)),              # wv
            pl.BlockSpec((1, E), lambda b, qi, ki: (0, 0)),              # bv
            pl.BlockSpec((E, E), lambda b, qi, ki: (0, 0)),              # wo
            pl.BlockSpec((1, E), lambda b, qi, ki: (0, 0)),              # bo
        ],
        out_specs=pl.BlockSpec((None, tq, E), lambda b, qi, ki: (b, qi, 0)),
        scratch_shapes=[
            pltpu.VMEM((num_heads, tq, Dh), jnp.bfloat16),   # qh (cached)
            pltpu.VMEM((num_heads, tk, Dh), jnp.bfloat16),   # kh
            pltpu.VMEM((num_heads, tk, Dh), jnp.bfloat16),   # vh
            pltpu.VMEM((num_heads, tq, 1), jnp.float32),     # running max
            pltpu.VMEM((num_heads, tq, 1), jnp.float32),     # running denom
            pltpu.VMEM((num_heads, tq, Dh), jnp.float32),    # f32 accumulator
            pltpu.VMEM((tq, E), jnp.bfloat16),               # head-merge buf
        ],
        compiler_params=pltpu.CompilerParams(
            dimension_semantics=("parallel", "parallel", "arbitrary"),
            vmem_limit_bytes=48 * 1024 * 1024),
    )(qb, kb, vb, wq_bd, bq, wk_bd, bk, wv_bd, bv, wo_t, bo)

    # proj_drop has p=0.0 -> identity
    return out


def _reference(q, k, v, params, num_heads):
    """Pure-JAX reference reproducing the PyTorch forward, for verification."""
    B, Tq, E = q.shape
    Tk = k.shape[1]
    Dh = E // num_heads
    qh = q.reshape(B, Tq, num_heads, Dh).transpose(0, 2, 1, 3)
    kh = k.reshape(B, Tk, num_heads, Dh).transpose(0, 2, 1, 3)
    vh = v.reshape(B, Tk, num_heads, Dh).transpose(0, 2, 1, 3)
    qp = jnp.einsum("bhtd,ed->bhte", qh, params["wq"]) + params["bq"]
    kp = jnp.einsum("bhtd,ed->bhte", kh, params["wk"]) + params["bk"]
    vp = jnp.einsum("bhtd,ed->bhte", vh, params["wv"]) + params["bv"]
    s = jnp.einsum("bhqd,bhkd->bhqk", qp, kp) / math.sqrt(Dh)
    p = jax.nn.softmax(s, axis=-1)
    a = jnp.einsum("bhqk,bhkd->bhqd", p, vp)
    x = a.transpose(0, 2, 1, 3).reshape(B, Tq, E)
    return jnp.einsum("bte,fe->btf", x, params["wo"]) + params["bo"]


def init_params(key, embed_dim, num_heads):
    dh = embed_dim // num_heads
    keys = jax.random.split(key, 8)

    def lin(kw, kb, out_f, in_f):
        bound = 1.0 / math.sqrt(in_f)
        w = jax.random.uniform(kw, (out_f, in_f), jnp.float32, -bound, bound)
        b = jax.random.uniform(kb, (out_f,), jnp.float32, -bound, bound)
        return w, b

    wq, bq = lin(keys[0], keys[1], dh, dh)
    wk, bk = lin(keys[2], keys[3], dh, dh)
    wv, bv = lin(keys[4], keys[5], dh, dh)
    wo, bo = lin(keys[6], keys[7], embed_dim, embed_dim)
    return {"wq": wq, "bq": bq, "wk": wk, "bk": bk,
            "wv": wv, "bv": bv, "wo": wo, "bo": bo}


if __name__ == "__main__":
    B, Tq, Tk, E, H = 2, 16, 16, 32, 4   # head_dim = 8

    key = jax.random.PRNGKey(0)
    kq, kk, kv, kp = jax.random.split(key, 4)
    q = jax.random.normal(kq, (B, Tq, E), jnp.float32)
    k = jax.random.normal(kk, (B, Tk, E), jnp.float32)
    v = jax.random.normal(kv, (B, Tk, E), jnp.float32)
    params = init_params(kp, E, H)

    ref = _reference(q, k, v, params, H)

    # Small tiles to exercise the multi-tile flash path (2 q-tiles x 2 kv-tiles
    # per batch element: init / accumulate / finalize across the KV grid axis).
    out_tiled = msa_forward(q, k, v, params, H, q_tile=8, kv_tile=8)
    out_tiled = jax.block_until_ready(out_tiled)
    assert out_tiled.shape == (B, Tq, E)
    # Tolerance reflects bf16 MXU operands (f32 accumulation) plus the EUP
    # approximate reciprocal in the softmax normalization.
    assert jnp.allclose(out_tiled, ref, atol=3e-2, rtol=3e-2), \
        "tiled kernel mismatch vs reference"

    # Default (single KV tile) path.
    out_full = msa_forward(q, k, v, params, H)
    out_full = jax.block_until_ready(out_full)
    assert jnp.allclose(out_full, ref, atol=3e-2, rtol=3e-2), \
        "full-tile kernel mismatch vs reference"

    print("KERNEL_OK")
</pallas_src>

<mosaic_0001>
module attributes {stable_mosaic.version = 11 : i64} {
  func.func @_msa_flash_kernel(%arg0: i32, %arg1: i32, %arg2: i32, %arg3: memref<1x8x32xbf16, #tpu.memory_space<vmem>>, %arg4: memref<1x8x32xbf16, #tpu.memory_space<vmem>>, %arg5: memref<1x8x32xbf16, #tpu.memory_space<vmem>>, %arg6: memref<32x32xbf16, #tpu.memory_space<vmem>>, %arg7: memref<1x32xf32, #tpu.memory_space<vmem>>, %arg8: memref<32x32xbf16, #tpu.memory_space<vmem>>, %arg9: memref<1x32xf32, #tpu.memory_space<vmem>>, %arg10: memref<32x32xbf16, #tpu.memory_space<vmem>>, %arg11: memref<1x32xf32, #tpu.memory_space<vmem>>, %arg12: memref<32x32xbf16, #tpu.memory_space<vmem>>, %arg13: memref<1x32xf32, #tpu.memory_space<vmem>>, %arg14: memref<1x8x32xf32, #tpu.memory_space<vmem>>, %arg15: memref<4x8x8xbf16, #tpu.memory_space<vmem>>, %arg16: memref<4x8x8xbf16, #tpu.memory_space<vmem>>, %arg17: memref<4x8x8xbf16, #tpu.memory_space<vmem>>, %arg18: memref<4x8x1xf32, #tpu.memory_space<vmem>>, %arg19: memref<4x8x1xf32, #tpu.memory_space<vmem>>, %arg20: memref<4x8x8xf32, #tpu.memory_space<vmem>>, %arg21: memref<8x32xbf16, #tpu.memory_space<vmem>>) attributes {dimension_semantics = [#tpu.dimension_semantics<parallel>, #tpu.dimension_semantics<parallel>, #tpu.dimension_semantics<arbitrary>], iteration_bounds = array<i64: 2, 2, 2>, scalar_prefetch = 0 : i64, scratch_operands = 7 : i64, tpu.core_type = #tpu.core_type<tc>, window_params = [{transform_indices = @transform_0, window_bounds = array<i64: 1, 8, 32>}, {transform_indices = @transform_1, window_bounds = array<i64: 1, 8, 32>}, {transform_indices = @transform_2, window_bounds = array<i64: 1, 8, 32>}, {pipeline_mode = #tpu.pipeline_mode<synchronous>, transform_indices = @transform_3, window_bounds = array<i64: 32, 32>}, {pipeline_mode = #tpu.pipeline_mode<synchronous>, transform_indices = @transform_4, window_bounds = array<i64: 1, 32>}, {pipeline_mode = #tpu.pipeline_mode<synchronous>, transform_indices = @transform_5, window_bounds = array<i64: 32, 32>}, {pipeline_mode = #tpu.pipeline_mode<synchronous>, transform_indices = @transform_6, window_bounds = array<i64: 1, 32>}, {pipeline_mode = #tpu.pipeline_mode<synchronous>, transform_indices = @transform_7, window_bounds = array<i64: 32, 32>}, {pipeline_mode = #tpu.pipeline_mode<synchronous>, transform_indices = @transform_8, window_bounds = array<i64: 1, 32>}, {pipeline_mode = #tpu.pipeline_mode<synchronous>, transform_indices = @transform_9, window_bounds = array<i64: 32, 32>}, {pipeline_mode = #tpu.pipeline_mode<synchronous>, transform_indices = @transform_10, window_bounds = array<i64: 1, 32>}, {transform_indices = @transform_11, window_bounds = array<i64: 1, 8, 32>}]} {
    %c0_i32 = arith.constant 0 : i32
    %0 = arith.cmpi eq, %arg2, %c0_i32 : i32
    %1 = arith.extui %0 : i1 to i32
    %c0_i32_0 = arith.constant 0 : i32
    %2 = arith.cmpi ne, %1, %c0_i32_0 : i32
    scf.if %2 {
      %c0_68 = arith.constant 0 : index
      %c0_69 = arith.constant 0 : index
      %c0_70 = arith.constant 0 : index
      %87 = vector.load %arg3[%c0_68, %c0_69, %c0_70] : memref<1x8x32xbf16, #tpu.memory_space<vmem>>, vector<1x8x32xbf16>
      %88 = vector.shape_cast %87 : vector<1x8x32xbf16> to vector<8x32xbf16>
      %c0_71 = arith.constant 0 : index
      %c0_72 = arith.constant 0 : index
      %89 = vector.load %arg6[%c0_71, %c0_72] : memref<32x32xbf16, #tpu.memory_space<vmem>>, vector<32x32xbf16>
      %cst_73 = arith.constant dense<0.000000e+00> : vector<8x32xf32>
      %90 = tpu.matmul %88, %89, %cst_73 {dimension_numbers = #tpu.dot_dimension_numbers<[1], [0], [0], [1], [0, 0, 1, 1], [], []>} : vector<8x32xbf16>, vector<32x32xbf16>, vector<8x32xf32> -> vector<8x32xf32>
      %c0_74 = arith.constant 0 : index
      %c0_75 = arith.constant 0 : index
      %91 = vector.load %arg7[%c0_74, %c0_75] : memref<1x32xf32, #tpu.memory_space<vmem>>, vector<1x32xf32>
      %92 = vector.broadcast %91 : vector<1x32xf32> to vector<8x32xf32>
      %93 = arith.addf %90, %92 : vector<8x32xf32>
      %94 = vector.extract_strided_slice %93 {offsets = [0, 0], sizes = [8, 8], strides = [1, 1]} : vector<8x32xf32> to vector<8x8xf32>
      %95 = arith.truncf %94 : vector<8x8xf32> to vector<8x8xbf16>
      %c0_76 = arith.constant 0 : index
      %c0_77 = arith.constant 0 : index
      %c0_78 = arith.constant 0 : index
      %96 = vector.load %arg15[%c0_76, %c0_77, %c0_78] : memref<4x8x8xbf16, #tpu.memory_space<vmem>>, vector<1x8x8xbf16>
      %97 = vector.shape_cast %96 : vector<1x8x8xbf16> to vector<8x8xbf16>
      %98 = vector.shape_cast %95 : vector<8x8xbf16> to vector<1x8x8xbf16>
      tpu.vector_store %arg15[%c0_76, %c0_77, %c0_78], %98 {strides = array<i32>} : memref<4x8x8xbf16, #tpu.memory_space<vmem>>, vector<1x8x8xbf16>,
      %99 = vector.extract_strided_slice %93 {offsets = [0, 8], sizes = [8, 8], strides = [1, 1]} : vector<8x32xf32> to vector<8x8xf32>
      %100 = arith.truncf %99 : vector<8x8xf32> to vector<8x8xbf16>
      %c1_79 = arith.constant 1 : index
      %c0_80 = arith.constant 0 : index
      %c0_81 = arith.constant 0 : index
      %101 = vector.load %arg15[%c1_79, %c0_80, %c0_81] : memref<4x8x8xbf16, #tpu.memory_space<vmem>>, vector<1x8x8xbf16>
      %102 = vector.shape_cast %101 : vector<1x8x8xbf16> to vector<8x8xbf16>
      %103 = vector.shape_cast %100 : vector<8x8xbf16> to vector<1x8x8xbf16>
      tpu.vector_store %arg15[%c1_79, %c0_80, %c0_81], %103 {strides = array<i32>} : memref<4x8x8xbf16, #tpu.memory_space<vmem>>, vector<1x8x8xbf16>,
      %104 = vector.extract_strided_slice %93 {offsets = [0, 16], sizes = [8, 8], strides = [1, 1]} : vector<8x32xf32> to vector<8x8xf32>
      %105 = arith.truncf %104 : vector<8x8xf32> to vector<8x8xbf16>
      %c2_82 = arith.constant 2 : index
      %c0_83 = arith.constant 0 : index
      %c0_84 = arith.constant 0 : index
      %106 = vector.load %arg15[%c2_82, %c0_83, %c0_84] : memref<4x8x8xbf16, #tpu.memory_space<vmem>>, vector<1x8x8xbf16>
      %107 = vector.shape_cast %106 : vector<1x8x8xbf16> to vector<8x8xbf16>
      %108 = vector.shape_cast %105 : vector<8x8xbf16> to vector<1x8x8xbf16>
      tpu.vector_store %arg15[%c2_82, %c0_83, %c0_84], %108 {strides = array<i32>} : memref<4x8x8xbf16, #tpu.memory_space<vmem>>, vector<1x8x8xbf16>,
      %109 = vector.extract_strided_slice %93 {offsets = [0, 24], sizes = [8, 8], strides = [1, 1]} : vector<8x32xf32> to vector<8x8xf32>
      %110 = arith.truncf %109 : vector<8x8xf32> to vector<8x8xbf16>
      %c3_85 = arith.constant 3 : index
      %c0_86 = arith.constant 0 : index
      %c0_87 = arith.constant 0 : index
      %111 = vector.load %arg15[%c3_85, %c0_86, %c0_87] : memref<4x8x8xbf16, #tpu.memory_space<vmem>>, vector<1x8x8xbf16>
      %112 = vector.shape_cast %111 : vector<1x8x8xbf16> to vector<8x8xbf16>
      %113 = vector.shape_cast %110 : vector<8x8xbf16> to vector<1x8x8xbf16>
      tpu.vector_store %arg15[%c3_85, %c0_86, %c0_87], %113 {strides = array<i32>} : memref<4x8x8xbf16, #tpu.memory_space<vmem>>, vector<1x8x8xbf16>,
      %cst_88 = arith.constant 0xFF800000 : f32
      %114 = vector.broadcast %cst_88 : f32 to vector<4x8x1xf32>
      %c0_89 = arith.constant 0 : index
      %c0_90 = arith.constant 0 : index
      %c0_91 = arith.constant 0 : index
      %115 = vector.load %arg18[%c0_89, %c0_90, %c0_91] : memref<4x8x1xf32, #tpu.memory_space<vmem>>, vector<4x8x1xf32>
      tpu.vector_store %arg18[%c0_89, %c0_90, %c0_91], %114 {strides = array<i32>} : memref<4x8x1xf32, #tpu.memory_space<vmem>>, vector<4x8x1xf32>,
      %cst_92 = arith.constant 0.000000e+00 : f32
      %116 = vector.broadcast %cst_92 : f32 to vector<4x8x1xf32>
      %c0_93 = arith.constant 0 : index
      %c0_94 = arith.constant 0 : index
      %c0_95 = arith.constant 0 : index
      %117 = vector.load %arg19[%c0_93, %c0_94, %c0_95] : memref<4x8x1xf32, #tpu.memory_space<vmem>>, vector<4x8x1xf32>
      tpu.vector_store %arg19[%c0_93, %c0_94, %c0_95], %116 {strides = array<i32>} : memref<4x8x1xf32, #tpu.memory_space<vmem>>, vector<4x8x1xf32>,
      %cst_96 = arith.constant 0.000000e+00 : f32
      %118 = vector.broadcast %cst_96 : f32 to vector<4x8x8xf32>
      %c0_97 = arith.constant 0 : index
      %c0_98 = arith.constant 0 : index
      %c0_99 = arith.constant 0 : index
      %119 = vector.load %arg20[%c0_97, %c0_98, %c0_99] : memref<4x8x8xf32, #tpu.memory_space<vmem>>, vector<4x8x8xf32>
      tpu.vector_store %arg20[%c0_97, %c0_98, %c0_99], %118 {strides = array<i32>} : memref<4x8x8xf32, #tpu.memory_space<vmem>>, vector<4x8x8xf32>,
    } else {
    }
    %c0 = arith.constant 0 : index
    %c0_1 = arith.constant 0 : index
    %c0_2 = arith.constant 0 : index
    %3 = vector.load %arg4[%c0, %c0_1, %c0_2] : memref<1x8x32xbf16, #tpu.memory_space<vmem>>, vector<1x8x32xbf16>
    %4 = vector.shape_cast %3 : vector<1x8x32xbf16> to vector<8x32xbf16>
    %c0_3 = arith.constant 0 : index
    %c0_4 = arith.constant 0 : index
    %5 = vector.load %arg8[%c0_3, %c0_4] : memref<32x32xbf16, #tpu.memory_space<vmem>>, vector<32x32xbf16>
    %cst = arith.constant dense<0.000000e+00> : vector<8x32xf32>
    %6 = tpu.matmul %4, %5, %cst {dimension_numbers = #tpu.dot_dimension_numbers<[1], [0], [0], [1], [0, 0, 1, 1], [], []>} : vector<8x32xbf16>, vector<32x32xbf16>, vector<8x32xf32> -> vector<8x32xf32>
    %c0_5 = arith.constant 0 : index
    %c0_6 = arith.constant 0 : index
    %7 = vector.load %arg9[%c0_5, %c0_6] : memref<1x32xf32, #tpu.memory_space<vmem>>, vector<1x32xf32>
    %8 = vector.broadcast %7 : vector<1x32xf32> to vector<8x32xf32>
    %9 = arith.addf %6, %8 : vector<8x32xf32>
    %c0_7 = arith.constant 0 : index
    %c0_8 = arith.constant 0 : index
    %c0_9 = arith.constant 0 : index
    %10 = vector.load %arg5[%c0_7, %c0_8, %c0_9] : memref<1x8x32xbf16, #tpu.memory_space<vmem>>, vector<1x8x32xbf16>
    %11 = vector.shape_cast %10 : vector<1x8x32xbf16> to vector<8x32xbf16>
    %c0_10 = arith.constant 0 : index
    %c0_11 = arith.constant 0 : index
    %12 = vector.load %arg10[%c0_10, %c0_11] : memref<32x32xbf16, #tpu.memory_space<vmem>>, vector<32x32xbf16>
    %cst_12 = arith.constant dense<0.000000e+00> : vector<8x32xf32>
    %13 = tpu.matmul %11, %12, %cst_12 {dimension_numbers = #tpu.dot_dimension_numbers<[1], [0], [0], [1], [0, 0, 1, 1], [], []>} : vector<8x32xbf16>, vector<32x32xbf16>, vector<8x32xf32> -> vector<8x32xf32>
    %c0_13 = arith.constant 0 : index
    %c0_14 = arith.constant 0 : index
    %14 = vector.load %arg11[%c0_13, %c0_14] : memref<1x32xf32, #tpu.memory_space<vmem>>, vector<1x32xf32>
    %15 = vector.broadcast %14 : vector<1x32xf32> to vector<8x32xf32>
    %16 = arith.addf %13, %15 : vector<8x32xf32>
    %17 = vector.extract_strided_slice %9 {offsets = [0, 0], sizes = [8, 8], strides = [1, 1]} : vector<8x32xf32> to vector<8x8xf32>
    %18 = arith.truncf %17 : vector<8x8xf32> to vector<8x8xbf16>
    %c0_15 = arith.constant 0 : index
    %c0_16 = arith.constant 0 : index
    %c0_17 = arith.constant 0 : index
    %19 = vector.load %arg16[%c0_15, %c0_16, %c0_17] : memref<4x8x8xbf16, #tpu.memory_space<vmem>>, vector<1x8x8xbf16>
    %20 = vector.shape_cast %19 : vector<1x8x8xbf16> to vector<8x8xbf16>
    %21 = vector.shape_cast %18 : vector<8x8xbf16> to vector<1x8x8xbf16>
    tpu.vector_store %arg16[%c0_15, %c0_16, %c0_17], %21 {strides = array<i32>} : memref<4x8x8xbf16, #tpu.memory_space<vmem>>, vector<1x8x8xbf16>,
    %22 = vector.extract_strided_slice %16 {offsets = [0, 0], sizes = [8, 8], strides = [1, 1]} : vector<8x32xf32> to vector<8x8xf32>
    %23 = arith.truncf %22 : vector<8x8xf32> to vector<8x8xbf16>
    %c0_18 = arith.constant 0 : index
    %c0_19 = arith.constant 0 : index
    %c0_20 = arith.constant 0 : index
    %24 = vector.load %arg17[%c0_18, %c0_19, %c0_20] : memref<4x8x8xbf16, #tpu.memory_space<vmem>>, vector<1x8x8xbf16>
    %25 = vector.shape_cast %24 : vector<1x8x8xbf16> to vector<8x8xbf16>
    %26 = vector.shape_cast %23 : vector<8x8xbf16> to vector<1x8x8xbf16>
    tpu.vector_store %arg17[%c0_18, %c0_19, %c0_20], %26 {strides = array<i32>} : memref<4x8x8xbf16, #tpu.memory_space<vmem>>, vector<1x8x8xbf16>,
    %27 = vector.extract_strided_slice %9 {offsets = [0, 8], sizes = [8, 8], strides = [1, 1]} : vector<8x32xf32> to vector<8x8xf32>
    %28 = arith.truncf %27 : vector<8x8xf32> to vector<8x8xbf16>
    %c1 = arith.constant 1 : index
    %c0_21 = arith.constant 0 : index
    %c0_22 = arith.constant 0 : index
    %29 = vector.load %arg16[%c1, %c0_21, %c0_22] : memref<4x8x8xbf16, #tpu.memory_space<vmem>>, vector<1x8x8xbf16>
    %30 = vector.shape_cast %29 : vector<1x8x8xbf16> to vector<8x8xbf16>
    %31 = vector.shape_cast %28 : vector<8x8xbf16> to vector<1x8x8xbf16>
    tpu.vector_store %arg16[%c1, %c0_21, %c0_22], %31 {strides = array<i32>} : memref<4x8x8xbf16, #tpu.memory_space<vmem>>, vector<1x8x8xbf16>,
    %32 = vector.extract_strided_slice %16 {offsets = [0, 8], sizes = [8, 8], strides = [1, 1]} : vector<8x32xf32> to vector<8x8xf32>
    %33 = arith.truncf %32 : vector<8x8xf32> to vector<8x8xbf16>
    %c1_23 = arith.constant 1 : index
    %c0_24 = arith.constant 0 : index
    %c0_25 = arith.constant 0 : index
    %34 = vector.load %arg17[%c1_23, %c0_24, %c0_25] : memref<4x8x8xbf16, #tpu.memory_space<vmem>>, vector<1x8x8xbf16>
    %35 = vector.shape_cast %34 : vector<1x8x8xbf16> to vector<8x8xbf16>
    %36 = vector.shape_cast %33 : vector<8x8xbf16> to vector<1x8x8xbf16>
    tpu.vector_store %arg17[%c1_23, %c0_24, %c0_25], %36 {strides = array<i32>} : memref<4x8x8xbf16, #tpu.memory_space<vmem>>, vector<1x8x8xbf16>,
    %37 = vector.extract_strided_slice %9 {offsets = [0, 16], sizes = [8, 8], strides = [1, 1]} : vector<8x32xf32> to vector<8x8xf32>
    %38 = arith.truncf %37 : vector<8x8xf32> to vector<8x8xbf16>
    %c2 = arith.constant 2 : index
    %c0_26 = arith.constant 0 : index
    %c0_27 = arith.constant 0 : index
    %39 = vector.load %arg16[%c2, %c0_26, %c0_27] : memref<4x8x8xbf16, #tpu.memory_space<vmem>>, vector<1x8x8xbf16>
    %40 = vector.shape_cast %39 : vector<1x8x8xbf16> to vector<8x8xbf16>
    %41 = vector.shape_cast %38 : vector<8x8xbf16> to vector<1x8x8xbf16>
    tpu.vector_store %arg16[%c2, %c0_26, %c0_27], %41 {strides = array<i32>} : memref<4x8x8xbf16, #tpu.memory_space<vmem>>, vector<1x8x8xbf16>,
    %42 = vector.extract_strided_slice %16 {offsets = [0, 16], sizes = [8, 8], strides = [1, 1]} : vector<8x32xf32> to vector<8x8xf32>
    %43 = arith.truncf %42 : vector<8x8xf32> to vector<8x8xbf16>
    %c2_28 = arith.constant 2 : index
    %c0_29 = arith.constant 0 : index
    %c0_30 = arith.constant 0 : index
    %44 = vector.load %arg17[%c2_28, %c0_29, %c0_30] : memref<4x8x8xbf16, #tpu.memory_space<vmem>>, vector<1x8x8xbf16>
    %45 = vector.shape_cast %44 : vector<1x8x8xbf16> to vector<8x8xbf16>
    %46 = vector.shape_cast %43 : vector<8x8xbf16> to vector<1x8x8xbf16>
    tpu.vector_store %arg17[%c2_28, %c0_29, %c0_30], %46 {strides = array<i32>} : memref<4x8x8xbf16, #tpu.memory_space<vmem>>, vector<1x8x8xbf16>,
    %47 = vector.extract_strided_slice %9 {offsets = [0, 24], sizes = [8, 8], strides = [1, 1]} : vector<8x32xf32> to vector<8x8xf32>
    %48 = arith.truncf %47 : vector<8x8xf32> to vector<8x8xbf16>
    %c3 = arith.constant 3 : index
    %c0_31 = arith.constant 0 : index
    %c0_32 = arith.constant 0 : index
    %49 = vector.load %arg16[%c3, %c0_31, %c0_32] : memref<4x8x8xbf16, #tpu.memory_space<vmem>>, vector<1x8x8xbf16>
    %50 = vector.shape_cast %49 : vector<1x8x8xbf16> to vector<8x8xbf16>
    %51 = vector.shape_cast %48 : vector<8x8xbf16> to vector<1x8x8xbf16>
    tpu.vector_store %arg16[%c3, %c0_31, %c0_32], %51 {strides = array<i32>} : memref<4x8x8xbf16, #tpu.memory_space<vmem>>, vector<1x8x8xbf16>,
    %52 = vector.extract_strided_slice %16 {offsets = [0, 24], sizes = [8, 8], strides = [1, 1]} : vector<8x32xf32> to vector<8x8xf32>
    %53 = arith.truncf %52 : vector<8x8xf32> to vector<8x8xbf16>
    %c3_33 = arith.constant 3 : index
    %c0_34 = arith.constant 0 : index
    %c0_35 = arith.constant 0 : index
    %54 = vector.load %arg17[%c3_33, %c0_34, %c0_35] : memref<4x8x8xbf16, #tpu.memory_space<vmem>>, vector<1x8x8xbf16>
    %55 = vector.shape_cast %54 : vector<1x8x8xbf16> to vector<8x8xbf16>
    %56 = vector.shape_cast %53 : vector<8x8xbf16> to vector<1x8x8xbf16>
    tpu.vector_store %arg17[%c3_33, %c0_34, %c0_35], %56 {strides = array<i32>} : memref<4x8x8xbf16, #tpu.memory_space<vmem>>, vector<1x8x8xbf16>,
    %c0_36 = arith.constant 0 : index
    %c0_37 = arith.constant 0 : index
    %c0_38 = arith.constant 0 : index
    %57 = vector.load %arg15[%c0_36, %c0_37, %c0_38] : memref<4x8x8xbf16, #tpu.memory_space<vmem>>, vector<4x8x8xbf16>
    %c0_39 = arith.constant 0 : index
    %c0_40 = arith.constant 0 : index
    %c0_41 = arith.constant 0 : index
    %58 = vector.load %arg16[%c0_39, %c0_40, %c0_41] : memref<4x8x8xbf16, #tpu.memory_space<vmem>>, vector<4x8x8xbf16>
    "tpu.trace_start"() <{level = 10 : i32, message = "htd,hsd->hts"}> : () -> ()
    %cst_42 = arith.constant dense<0.000000e+00> : vector<4x8x8xf32>
    %59 = tpu.matmul %57, %58, %cst_42 {dimension_numbers = #tpu.dot_dimension_numbers<[2], [2], [1], [1], [0, 0, 0, 1, 1, 1], [0], [0]>} : vector<4x8x8xbf16>, vector<4x8x8xbf16>, vector<4x8x8xf32> -> vector<4x8x8xf32>
    "tpu.trace_stop"() : () -> ()
    %c0_43 = arith.constant 0 : index
    %c0_44 = arith.constant 0 : index
    %c0_45 = arith.constant 0 : index
    %60 = vector.load %arg18[%c0_43, %c0_44, %c0_45] : memref<4x8x1xf32, #tpu.memory_space<vmem>>, vector<4x8x1xf32>
    %cst_46 = arith.constant dense<0xFF800000> : vector<4x8xf32>
    %61 = vector.multi_reduction <maximumf>, %59, %cst_46 [2] : vector<4x8x8xf32> to vector<4x8xf32>
    %62 = vector.shape_cast %61 : vector<4x8xf32> to vector<4x8x1xf32>
    %63 = arith.maximumf %60, %62 : vector<4x8x1xf32>
    %64 = arith.subf %60, %63 : vector<4x8x1xf32>
    %65 = math.exp %64 : vector<4x8x1xf32>
    %66 = vector.broadcast %63 : vector<4x8x1xf32> to vector<4x8x8xf32>
    %67 = arith.subf %59, %66 : vector<4x8x8xf32>
    %68 = math.exp %67 : vector<4x8x8xf32>
    %c0_47 = arith.constant 0 : index
    %c0_48 = arith.constant 0 : index
    %c0_49 = arith.constant 0 : index
    %69 = vector.load %arg19[%c0_47, %c0_48, %c0_49] : memref<4x8x1xf32, #tpu.memory_space<vmem>>, vector<4x8x1xf32>
    %70 = arith.mulf %65, %69 : vector<4x8x1xf32>
    %cst_50 = arith.constant dense<0.000000e+00> : vector<4x8xf32>
    %71 = vector.multi_reduction <add>, %68, %cst_50 [2] : vector<4x8x8xf32> to vector<4x8xf32>
    %72 = vector.shape_cast %71 : vector<4x8xf32> to vector<4x8x1xf32>
    %73 = arith.addf %70, %72 : vector<4x8x1xf32>
    %c0_51 = arith.constant 0 : index
    %c0_52 = arith.constant 0 : index
    %c0_53 = arith.constant 0 : index
    %74 = vector.load %arg19[%c0_51, %c0_52, %c0_53] : memref<4x8x1xf32, #tpu.memory_space<vmem>>, vector<4x8x1xf32>
    tpu.vector_store %arg19[%c0_51, %c0_52, %c0_53], %73 {strides = array<i32>} : memref<4x8x1xf32, #tpu.memory_space<vmem>>, vector<4x8x1xf32>,
    %c0_54 = arith.constant 0 : index
    %c0_55 = arith.constant 0 : index
    %c0_56 = arith.constant 0 : index
    %75 = vector.load %arg20[%c0_54, %c0_55, %c0_56] : memref<4x8x8xf32, #tpu.memory_space<vmem>>, vector<4x8x8xf32>
    %76 = vector.broadcast %65 : vector<4x8x1xf32> to vector<4x8x8xf32>
    %77 = arith.mulf %76, %75 : vector<4x8x8xf32>
    %78 = arith.truncf %68 : vector<4x8x8xf32> to vector<4x8x8xbf16>
    %c0_57 = arith.constant 0 : index
    %c0_58 = arith.constant 0 : index
    %c0_59 = arith.constant 0 : index
    %79 = vector.load %arg17[%c0_57, %c0_58, %c0_59] : memref<4x8x8xbf16, #tpu.memory_space<vmem>>, vector<4x8x8xbf16>
    "tpu.trace_start"() <{level = 10 : i32, message = "hts,hsd->htd"}> : () -> ()
    %cst_60 = arith.constant dense<0.000000e+00> : vector<4x8x8xf32>
    %80 = tpu.matmul %78, %79, %cst_60 {dimension_numbers = #tpu.dot_dimension_numbers<[2], [1], [1], [2], [0, 0, 0, 1, 1, 2], [0], [0]>} : vector<4x8x8xbf16>, vector<4x8x8xbf16>, vector<4x8x8xf32> -> vector<4x8x8xf32>
    "tpu.trace_stop"() : () -> ()
    %81 = arith.addf %77, %80 : vector<4x8x8xf32>
    %c0_61 = arith.constant 0 : index
    %c0_62 = arith.constant 0 : index
    %c0_63 = arith.constant 0 : index
    %82 = vector.load %arg20[%c0_61, %c0_62, %c0_63] : memref<4x8x8xf32, #tpu.memory_space<vmem>>, vector<4x8x8xf32>
    tpu.vector_store %arg20[%c0_61, %c0_62, %c0_63], %81 {strides = array<i32>} : memref<4x8x8xf32, #tpu.memory_space<vmem>>, vector<4x8x8xf32>,
    %c0_64 = arith.constant 0 : index
    %c0_65 = arith.constant 0 : index
    %c0_66 = arith.constant 0 : index
    %83 = vector.load %arg18[%c0_64, %c0_65, %c0_66] : memref<4x8x1xf32, #tpu.memory_space<vmem>>, vector<4x8x1xf32>
    tpu.vector_store %arg18[%c0_64, %c0_65, %c0_66], %63 {strides = array<i32>} : memref<4x8x1xf32, #tpu.memory_space<vmem>>, vector<4x8x1xf32>,
    %c1_i32 = arith.constant 1 : i32
    %84 = arith.cmpi eq, %arg2, %c1_i32 : i32
    %85 = arith.extui %84 : i1 to i32
    %c0_i32_67 = arith.constant 0 : i32
    %86 = arith.cmpi ne, %85, %c0_i32_67 : i32
    scf.if %86 {
      %c0_68 = arith.constant 0 : index
      %c0_69 = arith.constant 0 : index
      %c0_70 = arith.constant 0 : index
      %87 = vector.load %arg19[%c0_68, %c0_69, %c0_70] : memref<4x8x1xf32, #tpu.memory_space<vmem>>, vector<4x8x1xf32>
      %88 = tpu.reciprocal %87 {approx = true} : vector<4x8x1xf32> -> vector<4x8x1xf32>
      %c0_71 = arith.constant 0 : index
      %c0_72 = arith.constant 0 : index
      %c0_73 = arith.constant 0 : index
      %89 = vector.load %arg20[%c0_71, %c0_72, %c0_73] : memref<4x8x8xf32, #tpu.memory_space<vmem>>, vector<4x8x8xf32>
      %90 = vector.broadcast %88 : vector<4x8x1xf32> to vector<4x8x8xf32>
      %91 = arith.mulf %89, %90 : vector<4x8x8xf32>
      %92 = vector.extract_strided_slice %91 {offsets = [0, 0, 0], sizes = [1, 8, 8], strides = [1, 1, 1]} : vector<4x8x8xf32> to vector<1x8x8xf32>
      %93 = vector.shape_cast %92 : vector<1x8x8xf32> to vector<8x8xf32>
      %94 = arith.truncf %93 : vector<8x8xf32> to vector<8x8xbf16>
      %c0_74 = arith.constant 0 : index
      %c0_75 = arith.constant 0 : index
      %95 = vector.load %arg21[%c0_74, %c0_75] : memref<8x32xbf16, #tpu.memory_space<vmem>>, vector<8x8xbf16>
      tpu.vector_store %arg21[%c0_74, %c0_75], %94 {strides = array<i32>} : memref<8x32xbf16, #tpu.memory_space<vmem>>, vector<8x8xbf16>,
      %96 = vector.extract_strided_slice %91 {offsets = [1, 0, 0], sizes = [1, 8, 8], strides = [1, 1, 1]} : vector<4x8x8xf32> to vector<1x8x8xf32>
      %97 = vector.shape_cast %96 : vector<1x8x8xf32> to vector<8x8xf32>
      %98 = arith.truncf %97 : vector<8x8xf32> to vector<8x8xbf16>
      %c0_76 = arith.constant 0 : index
      %c8 = arith.constant 8 : index
      %99 = vector.load %arg21[%c0_76, %c8] : memref<8x32xbf16, #tpu.memory_space<vmem>>, vector<8x8xbf16>
      tpu.vector_store %arg21[%c0_76, %c8], %98 {strides = array<i32>} : memref<8x32xbf16, #tpu.memory_space<vmem>>, vector<8x8xbf16>,
      %100 = vector.extract_strided_slice %91 {offsets = [2, 0, 0], sizes = [1, 8, 8], strides = [1, 1, 1]} : vector<4x8x8xf32> to vector<1x8x8xf32>
      %101 = vector.shape_cast %100 : vector<1x8x8xf32> to vector<8x8xf32>
      %102 = arith.truncf %101 : vector<8x8xf32> to vector<8x8xbf16>
      %c0_77 = arith.constant 0 : index
      %c16 = arith.constant 16 : index
      %103 = vector.load %arg21[%c0_77, %c16] : memref<8x32xbf16, #tpu.memory_space<vmem>>, vector<8x8xbf16>
      tpu.vector_store %arg21[%c0_77, %c16], %102 {strides = array<i32>} : memref<8x32xbf16, #tpu.memory_space<vmem>>, vector<8x8xbf16>,
      %104 = vector.extract_strided_slice %91 {offsets = [3, 0, 0], sizes = [1, 8, 8], strides = [1, 1, 1]} : vector<4x8x8xf32> to vector<1x8x8xf32>
      %105 = vector.shape_cast %104 : vector<1x8x8xf32> to vector<8x8xf32>
      %106 = arith.truncf %105 : vector<8x8xf32> to vector<8x8xbf16>
      %c0_78 = arith.constant 0 : index
      %c24 = arith.constant 24 : index
      %107 = vector.load %arg21[%c0_78, %c24] : memref<8x32xbf16, #tpu.memory_space<vmem>>, vector<8x8xbf16>
      tpu.vector_store %arg21[%c0_78, %c24], %106 {strides = array<i32>} : memref<8x32xbf16, #tpu.memory_space<vmem>>, vector<8x8xbf16>,
      %c0_79 = arith.constant 0 : index
      %c0_80 = arith.constant 0 : index
      %108 = vector.load %arg21[%c0_79, %c0_80] : memref<8x32xbf16, #tpu.memory_space<vmem>>, vector<8x32xbf16>
      %c0_81 = arith.constant 0 : index
      %c0_82 = arith.constant 0 : index
      %109 = vector.load %arg12[%c0_81, %c0_82] : memref<32x32xbf16, #tpu.memory_space<vmem>>, vector<32x32xbf16>
      %cst_83 = arith.constant dense<0.000000e+00> : vector<8x32xf32>
      %110 = tpu.matmul %108, %109, %cst_83 {dimension_numbers = #tpu.dot_dimension_numbers<[1], [0], [0], [1], [0, 0, 1, 1], [], []>} : vector<8x32xbf16>, vector<32x32xbf16>, vector<8x32xf32> -> vector<8x32xf32>
      %c0_84 = arith.constant 0 : index
      %c0_85 = arith.constant 0 : index
      %111 = vector.load %arg13[%c0_84, %c0_85] : memref<1x32xf32, #tpu.memory_space<vmem>>, vector<1x32xf32>
      %112 = vector.broadcast %111 : vector<1x32xf32> to vector<8x32xf32>
      %113 = arith.addf %110, %112 : vector<8x32xf32>
      %c0_86 = arith.constant 0 : index
      %c0_87 = arith.constant 0 : index
      %c0_88 = arith.constant 0 : index
      %114 = vector.load %arg14[%c0_86, %c0_87, %c0_88] : memref<1x8x32xf32, #tpu.memory_space<vmem>>, vector<1x8x32xf32>
      %115 = vector.shape_cast %114 : vector<1x8x32xf32> to vector<8x32xf32>
      %116 = vector.shape_cast %113 : vector<8x32xf32> to vector<1x8x32xf32>
      tpu.vector_store %arg14[%c0_86, %c0_87, %c0_88], %116 {strides = array<i32>} : memref<1x8x32xf32, #tpu.memory_space<vmem>>, vector<1x8x32xf32>,
    } else {
    }
    return
  }
  func.func @transform_0(%arg0: i32, %arg1: i32, %arg2: i32) -> (i32, i32, i32) {
    %c0_i32 = arith.constant 0 : i32
    %c0_i32_0 = arith.constant 0 : i32
    return %arg0, %arg1, %c0_i32 : i32, i32, i32
  }
  func.func @transform_1(%arg0: i32, %arg1: i32, %arg2: i32) -> (i32, i32, i32) {
    %c0_i32 = arith.constant 0 : i32
    %c0_i32_0 = arith.constant 0 : i32
    return %arg0, %arg2, %c0_i32 : i32, i32, i32
  }
  func.func @transform_2(%arg0: i32, %arg1: i32, %arg2: i32) -> (i32, i32, i32) {
    %c0_i32 = arith.constant 0 : i32
    %c0_i32_0 = arith.constant 0 : i32
    return %arg0, %arg2, %c0_i32 : i32, i32, i32
  }
  func.func @transform_3(%arg0: i32, %arg1: i32, %arg2: i32) -> (i32, i32) {
    %c0_i32 = arith.constant 0 : i32
    %c0_i32_0 = arith.constant 0 : i32
    %c0_i32_1 = arith.constant 0 : i32
    return %c0_i32, %c0_i32_0 : i32, i32
  }
  func.func @transform_4(%arg0: i32, %arg1: i32, %arg2: i32) -> (i32, i32) {
    %c0_i32 = arith.constant 0 : i32
    %c0_i32_0 = arith.constant 0 : i32
    %c0_i32_1 = arith.constant 0 : i32
    return %c0_i32, %c0_i32_0 : i32, i32
  }
  func.func @transform_5(%arg0: i32, %arg1: i32, %arg2: i32) -> (i32, i32) {
    %c0_i32 = arith.constant 0 : i32
    %c0_i32_0 = arith.constant 0 : i32
    %c0_i32_1 = arith.constant 0 : i32
    return %c0_i32, %c0_i32_0 : i32, i32
  }
  func.func @transform_6(%arg0: i32, %arg1: i32, %arg2: i32) -> (i32, i32) {
    %c0_i32 = arith.constant 0 : i32
    %c0_i32_0 = arith.constant 0 : i32
    %c0_i32_1 = arith.constant 0 : i32
    return %c0_i32, %c0_i32_0 : i32, i32
  }
  func.func @transform_7(%arg0: i32, %arg1: i32, %arg2: i32) -> (i32, i32) {
    %c0_i32 = arith.constant 0 : i32
    %c0_i32_0 = arith.constant 0 : i32
    %c0_i32_1 = arith.constant 0 : i32
    return %c0_i32, %c0_i32_0 : i32, i32
  }
  func.func @transform_8(%arg0: i32, %arg1: i32, %arg2: i32) -> (i32, i32) {
    %c0_i32 = arith.constant 0 : i32
    %c0_i32_0 = arith.constant 0 : i32
    %c0_i32_1 = arith.constant 0 : i32
    return %c0_i32, %c0_i32_0 : i32, i32
  }
  func.func @transform_9(%arg0: i32, %arg1: i32, %arg2: i32) -> (i32, i32) {
    %c0_i32 = arith.constant 0 : i32
    %c0_i32_0 = arith.constant 0 : i32
    %c0_i32_1 = arith.constant 0 : i32
    return %c0_i32, %c0_i32_0 : i32, i32
  }
  func.func @transform_10(%arg0: i32, %arg1: i32, %arg2: i32) -> (i32, i32) {
    %c0_i32 = arith.constant 0 : i32
    %c0_i32_0 = arith.constant 0 : i32
    %c0_i32_1 = arith.constant 0 : i32
    return %c0_i32, %c0_i32_0 : i32, i32
  }
  func.func @transform_11(%arg0: i32, %arg1: i32, %arg2: i32) -> (i32, i32, i32) {
    %c0_i32 = arith.constant 0 : i32
    %c0_i32_0 = arith.constant 0 : i32
    return %arg0, %arg1, %c0_i32 : i32, i32, i32
  }
}

</mosaic_0001>

<bundles_post_ra>
// kernel: tpu_custom_call.1
= control target key start
LH: loop header
LB: loop body
LE: loop exit
PB: predicated region body
PF: predicated region fallthrough
CT: control target
= control target key end

     0   :  { %s2566_s0 = inlined_call_operand.hbm [shape: bf16[2,16,32], index: 0, kind: input, shape index: {}]   ;;  %s2567_s1 = inlined_call_operand.hbm [shape: bf16[2,16,32], index: 1, kind: input, shape index: {}]   ;;  %s2568_s2 = inlined_call_operand.hbm [shape: bf16[2,16,32], index: 2, kind: input, shape index: {}]   ;;  %s2569_s3 = inlined_call_operand.hbm [shape: bf16[32,32], index: 3, kind: input, shape index: {}]   ;;  %s2570_s4 = inlined_call_operand.vmem [shape: f32[1,32], index: 4, kind: input, shape index: {}]   ;;  %s2571_s5 = inlined_call_operand.hbm [shape: bf16[32,32], index: 5, kind: input, shape index: {}]   ;;  %s2572_s6 = inlined_call_operand.vmem [shape: f32[1,32], index: 6, kind: input, shape index: {}]   ;;  %s2573_s7 = inlined_call_operand.hbm [shape: bf16[32,32], index: 7, kind: input, shape index: {}]   ;;  %s2574_s8 = inlined_call_operand.vmem [shape: f32[1,32], index: 8, kind: input, shape index: {}]   ;;  %s2575_s9 = inlined_call_operand.hbm [shape: bf16[32,32], index: 9, kind: input, shape index: {}]   ;;  %s2576_s10 = inlined_call_operand.vmem [shape: f32[1,32], index: 10, kind: input, shape index: {}]   ;;  %s2577_s11 = inlined_call_operand.hbm [shape: f32[2,16,32], index: 11, kind: output, shape index: {}]  }
   0x1   :  { %2599 = sst [smem:[#allocation41_spill]] %s2567_s1 }
   0x2   :  { %2600 = sst [smem:[#allocation42_spill]] %s2568_s2 }
   0x3   :  { %2601 = sst [smem:[#allocation43_spill]] %s2569_s3 }
   0x4   :  { %2602 = sst [smem:[#allocation44_spill]] %s2570_s4 }
   0x5   :  { %2603 = sst [smem:[#allocation45_spill]] %s2571_s5 }
   0x6   :  { %2604 = sst [smem:[#allocation46_spill]] %s2572_s6 }
   0x7   :  { %2605 = sst [smem:[#allocation47_spill]] %s2573_s7 }
   0x8   :  { %2606 = sst [smem:[#allocation48_spill]] %s2574_s8 }
   0x9   :  { %2607 = sst [smem:[#allocation49_spill]] %s2575_s9 }
   0xa   :  { %2608 = sst [smem:[#allocation50_spill]] %s2576_s10 }
   0xb   :  { %2609 = sst [smem:[#allocation51_spill]] %s2577_s11 }
   0xc   :  { %16 = vsyncpa [#allocation10], 0 }
   0xd   :  { %18 = vsyncpa [#allocation10 + $0x1], 0 }
   0xe   :  { %19 = vsyncpa [#allocation13], 0 }
   0xf   :  { %21 = vsyncpa [#allocation13 + $0x1], 0 }
  0x10   :  { %22 = vsyncpa [#allocation16], 0 }
  0x11   :  { %23 = vsyncpa [#allocation19], 0 }
  0x12   :  { %24 = vsyncpa [#allocation11], 0 }
  0x13   :  { %26 = vsyncpa [#allocation11 + $0x1], 0  ;;  %s2107_s17 = smov 0   ;;  %s2109_s18 = smov 0  }
  0x14   :  { %s2111_s19 = smov 0   ;;  %s2113_s20 = smov 0  }
  0x15   :  { %s2115_s21 = smov 0   ;;  %s2117_s22 = smov 0  }
  0x16   :  { %s2119_s23 = smov 0   ;;  %s2121_s24 = smov 0  }
  0x17   :  { %s2123_s25 = smov 0   ;;  %s2125_s26 = smov 0  }
  0x18   :  { %s2127_s27 = smov 0   ;;  %s2129_s28 = smov 0  }
  0x19   :  { %s2131_s29 = smov 0  }
  0x1a LB: > { %2610 = sst [smem:[#allocation27_spill]] %s1982_s18  ;;  %s2173_s30 = sadd.s32 4294967295, %s2026_s29   ;;  %s2026_s29 = sphi %s2131_s29, %s32_s29   ;;  %s2022_s28 = sphi %s2129_s28, %s2679_s28   ;;  %s2018_s27 = sphi %s2127_s27, %s2678_s27   ;;  %s2014_s26 = sphi %s2125_s26, %s2677_s26   ;;  %s2010_s25 = sphi %s2123_s25, %s2676_s25   ;;  %s2006_s24 = sphi %s2121_s24, %s2675_s24   ;;  %s2002_s23 = sphi %s2119_s23, %s2674_s23   ;;  %s1998_s22 = sphi %s2117_s22, %s2673_s22   ;;  %s1994_s21 = sphi %s2115_s21, %s2672_s21   ;;  %s1990_s20 = sphi %s2113_s20, %s2667_s20   ;;  %s1986_s19 = sphi %s2111_s19, %s2671_s19   ;;  %s1982_s18 = sphi %s2109_s18, %s2670_s18   ;;  %s1978_s17 = sphi %s2107_s17, %s2666_s17  }
  0x1b   : > { %2611 = sst [smem:[#allocation28_spill]] %s1990_s20  ;;  %p1366_p0 = scmp.ge.s32.totalorder %s2026_s29, 1 }
  0x1c   : > { %2612 = sst [smem:[#allocation29_spill]] %s1994_s21  ;;  %p74_p1 = scmp.eq.s32.totalorder %s2173_s30, 0 }
  0x1d   : > { %2613 = sst [smem:[#allocation30_spill]] %s2002_s23  ;;  %p336_p2 = scmp.lt.s32.totalorder %s2026_s29, 9 }
  0x1e   : > { %2614 = sst [smem:[#allocation31_spill]] %s2006_s24  ;;  %s2028_s16 = smov [#allocation15]  }
  0x1f   : > { %2615 = sst [smem:[#allocation32_spill]] %s2010_s25  ;;  %p2181_p3 = pnand %p1366_p0, %p336_p2 }
  0x20   : > { %2616 = sst [smem:[#allocation33_spill]] %s2173_s30  ;;  %s349_s11 = sshll.u32 %s2028_s16, 4  ;;  %s350_s11 = int_to_ptr.vmem [resolvable:$true] %s349_s11 }
  0x21   : > { %s2617_s3 = sld [smem:[#allocation43_spill]]  ;;  %p1473_p4 = pneg %p2181_p3 }
  0x22   : > { %s2618_s15 = scalar_select %p2181_p3, 1, 0 }
  0x23   : > { %p2189_p5 = pnand %p1473_p4, %p74_p1  ;;  %s2621_s7 = sld [smem:[#allocation47_spill]] }
  0x24   : > { %2619 = sst [smem:[#allocation34_spill]] %s2618_s15  ;;  %s2579_s16 = smov 64  }
  0x25   : > { %s2581_s25 = smov 4   ;;  %s2031_s10 = smov [#allocation18]  }
  0x26   : > { %s44_s13 = sadd.s32 1, %s2014_s26  ;;  %p68_p7 = scmp.eq.s32.totalorder %s2026_s29, 0 }
  0x27   : > { %s347_s14 = sshll.u32 %s2617_s3, 4  ;;  %s383_s3 = sshll.u32 %s2031_s10, 4  ;;  %s348_s14 = int_to_ptr.hbm [resolvable:$true] %s347_s14  ;;  %s384_s3 = int_to_ptr.vmem [resolvable:$true] %s383_s3 }
  0x28   : > { %1476 = dma.hbm_to_vmem [thread:$0]  (!%p2189_p5), %s348_s14, 256, %s350_s11, [#allocation16], %s2579_s16, %s2579_s16, %s2581_s25  }
  0x29   : > { %s381_s24 = sshll.u32 %s2621_s7, 4  ;;  %p2208_p6 = scmp.ge.s32.totalorder %s44_s13, 2  ;;  %s382_s24 = int_to_ptr.hbm [resolvable:$true] %s381_s24 }
  0x2a   : > { %1482 = dma.hbm_to_vmem [thread:$0]  (!%p2189_p5), %s382_s24, 256, %s384_s3, [#allocation19], %s2579_s16, %s2579_s16, %s2581_s25  }
  0x2b   : > { %p95_p8 = scmp.ne.s32.totalorder %s1986_s19, %s1982_s18  ;;  %s2681_s13 = smov (%p2208_p6, %s44_s13), 0 }
  0x2c   : > { %p101_p10 = scmp.ne.s32.totalorder %s1982_s18, %s1978_s17  ;;  %p1504_p11 = scmp.lt.s32.totalorder %s2026_s29, 8 }
  0x2d   : > { %p2222_p9 = por %p95_p8, %p68_p7  ;;  %s2587_s3 = sshll.u32 %s2022_s28, 1 }
  0x2e   : > { %p2233_p12 = por %p101_p10, %p74_p1  ;;  %s438_s11 = sand.u32 1, %s2026_s29  }
  0x2f   : > { %s440_s7 = sand.u32 1, %s1986_s19   ;;  %s446_s25 = sadd.s32 %s2014_s26, %s2587_s3 }
  0x30   : > { %s2624_s14 = scalar_select %p2233_p12, 1, 0 }
  0x31   : > { %s2240_s16 = sshll.u32 %s440_s7, 2  ;;  %s1377_s6 = sshll.u32 %s446_s25, 2 }
  0x32   : > { %2625 = sst [smem:[#allocation35_spill]] %s2624_s14  ;;  %s442_s4 = scalar_lea.vmem [#allocation12], %s2240_s16 }
  0x33   : > { %s452_s23 = sshll.u32 %s442_s4, 4  ;;  %s2626_s1 = sld [smem:[#allocation41_spill]]  ;;  %s453_s23 = int_to_ptr.vmem [resolvable:$true] %s452_s23 }
  0x34   : > { %p2253_p13 = pnand %p1504_p11, %p2222_p9  ;;  %s2628_s2 = sld [smem:[#allocation42_spill]] }
  0x35   : > { %s2262_s24 = scalar_lea.sflag [#allocation13], %s438_s11  ;;  %s2629_s5 = sld [smem:[#allocation45_spill]] }
  0x36   : > { %s2032_s7 = smov [#allocation17]   ;;  %s2630_s9 = sld [smem:[#allocation49_spill]] }
  0x37   : > { %s47_s11 = sadd.s32 1, %s2018_s27  ;;  %s60_s25 = sadd.s32 1, %s1998_s22 }
  0x38   : > { %s2683_s11 = smov (!%p2208_p6, %s47_s11), %s2018_s27  ;;  %p67_p0 = scmp.ne.s32.totalorder %s1998_s22, %s1994_s21 }
  0x39   : > { %s448_s18 = scalar_lea.hbm %s2626_s1, %s1377_s6  ;;  %p49_p2 = scmp.ge.s32.totalorder %s2683_s11, 2 }
  0x3a   : > { %s450_s15 = sshll.u32 %s448_s18, 4  ;;  %s2260_s4 = scalar_lea.hbm %s2628_s2, %s1377_s6  ;;  %s451_s15 = int_to_ptr.hbm [resolvable:$true] %s450_s15 }
  0x3b   : > { %1492 = dma.hbm_to_vmem [thread:$0]  (!%p2253_p13), %s451_s15, 64, %s453_s23, %s2262_s24  }
  0x3c   : > { %s364_s17 = sshll.u32 %s2629_s5, 4  ;;  %s366_s6 = sshll.u32 %s2032_s7, 4  ;;  %s365_s17 = int_to_ptr.hbm [resolvable:$true] %s364_s17  ;;  %s367_s6 = int_to_ptr.vmem [resolvable:$true] %s366_s6 }
  0x3d   : > { %s398_s3 = sshll.u32 %s2630_s9, 4  ;;  %s2631_s23 = smov 4   ;;  %s399_s3 = int_to_ptr.hbm [resolvable:$true] %s398_s3 }
  0x3e   : > { %s2632_s15 = smov 64   ;;  %s2033_s18 = smov [#allocation20]  }
  0x3f   : > { %1479 = dma.hbm_to_vmem [thread:$0]  (!%p2189_p5), %s365_s17, 256, %s367_s6, [#allocation16], %s2632_s15, %s2632_s15, %s2631_s23  }
  0x40   : > { %s400_s10 = sshll.u32 %s2033_s18, 4  ;;  %s1365_s7 = sadd.s32 4294967294, %s2026_s29   ;;  %s401_s10 = int_to_ptr.vmem [resolvable:$true] %s400_s10 }
  0x41   : > { %1485 = dma.hbm_to_vmem [thread:$0]  (!%p2189_p5), %s399_s3, 256, %s401_s10, [#allocation19], %s2632_s15, %s2632_s15, %s2631_s23  }
  0x42   : > { %p73_p4 = scmp.ne.s32.totalorder %s1994_s21, %s1990_s20  ;;  %p2295_p8 = por %p68_p7, %p67_p0 }
  0x43   : > { %p323_p9 = scmp.eq.s32.totalorder %s2173_s30, 7  ;;  %s2685_s11 = smov (%p49_p2, %s2683_s11), 0 }
  0x44   : > { %2634 = sst [smem:[#allocation36_spill]] %s2685_s11  ;;  %s2635_s12 = sadd.s32 1, %s2022_s28 }
  0x45   : > { %s2687_s12 = smov (!%p49_p2, %s2635_s12), %s2022_s28  ;;  %s56_s8 = ssub.s32 %s2018_s27, %s2685_s11 }
  0x46   : > { %p2309_p5 = por %p74_p1, %p73_p4  ;;  %p53_p6 = scmp.ge.s32.totalorder %s2687_s12, 2 }
  0x47   : > { %p2313_p7 = por %p323_p9, %p67_p0  ;;  %p329_p10 = scmp.eq.s32.totalorder %s1365_s7, 7 }
  0x48   : > { %s2636_s3 = scalar_select %p2309_p5, 1, 0 }
  0x49   : > { %s2638_s6 = scalar_select %p2313_p7, 1, 0 }
  0x4a   : > { %2637 = sst [smem:[#allocation37_spill]] %s2636_s3  ;;  %s417_s23 = sand.u32 1, %s1998_s22  }
  0x4b   : > { %2639 = sst [smem:[#allocation38_spill]] %s2638_s6  ;;  %s2689_s12 = smov (%p53_p6, %s2687_s12), 0 }
  0x4c   : > { %2640 = sst [smem:[#allocation39_spill]] %s2689_s12  ;;  %p2320_p2 = por %p329_p10, %p73_p4 }
  0x4d   : > { %s55_s18 = ssub.s32 %s2022_s28, %s2689_s12  ;;  %s1372_s10 = sshll.u32 %s417_s23, 2 }
  0x4e   : > { %s2641_s15 = scalar_select %p2320_p2, 1, 0 }
  0x4f   : > { %s57_s1 = sor.u32 %s56_s8, %s55_s18  ;;  %s2643_s2 = ssub.s32 %s2014_s26, %s2681_s13 }
  0x50   : > { %2642 = sst [smem:[#allocation40_spill]] %s2641_s15  ;;  %s85_s5 = sor.u32 %s2643_s2, %s55_s18 }
  0x51   : > { %p58_p0 = scmp.eq.s32.totalorder %s57_s1, 0  ;;  %p86_p9 = scmp.eq.s32.totalorder %s85_s5, 0 }
  0x52   : > { %s2644_s9 = sshll.u32 %s2022_s28, 1  ;;  %s2645_s20 = sadd.s32 1, %s1986_s19 }
  0x53   : > { %s425_s7 = sadd.s32 %s2018_s27, %s2644_s9  ;;  %s421_s30 = scalar_lea.vmem [#allocation9], %s1372_s10 }
  0x54   : > { %s2333_s11 = scalar_select %p58_p0, %s1998_s22, %s60_s25  }
  0x55   : > { %s2338_s6 = scalar_select %p86_p9, %s1986_s19, %s2645_s20  }
  0x56   : > { %s1374_s15 = sshll.u32 %s425_s7, 2  ;;  %s431_s12 = sshll.u32 %s421_s30, 4  ;;  %s432_s12 = int_to_ptr.vmem [resolvable:$true] %s431_s12 }
  0x57   : > { %s427_s8 = scalar_lea.hbm %s2566_s0, %s1374_s15  ;;  %p1487_p4 = pnand %p1504_p11, %p2295_p8 }
  0x58   : > { %s429_s1 = sshll.u32 %s427_s8, 4  ;;  %s471_s2 = sshll.u32 %s2260_s4, 4  ;;  %s430_s1 = int_to_ptr.hbm [resolvable:$true] %s429_s1  ;;  %s472_s2 = int_to_ptr.hbm [resolvable:$true] %s471_s2 }
  0x59   : > { %s418_s5 = scalar_lea.sflag [#allocation10], %s417_s23  ;;  %s463_s9 = scalar_lea.vmem [#allocation14], %s2240_s16 }
  0x5a   : > { %1489 = dma.hbm_to_vmem [thread:$0]  (!%p1487_p4), %s430_s1, 64, %s432_s12, %s418_s5  }
  0x5b   : > { %s473_s20 = sshll.u32 %s463_s9, 4  ;;  %482 = sbr.rel (%p2181_p3) target bundleno = 1632 (0x660), region = 64  ;;  %s474_s20 = int_to_ptr.vmem [resolvable:$true] %s473_s20 }
  0x5c   : > { %1495 = dma.hbm_to_vmem [thread:$0]  (!%p2253_p13), %s472_s2, 64, %s474_s20, %s2262_s24  }
  0x5d   : > { %s2647_s21 = sld [smem:[#allocation29_spill]] (!%p2181_p3) }
  0x63   : > { %s2355_s3 = sand.u32 1, %s2647_s21  }
  0x64   : > { %s1382_s17 = sshll.u32 %s2355_s3, 2  ;;  %s485_s15 = scalar_lea.sflag [#allocation10], %s2355_s3 }
  0x65   : > { %s488_s4 = scalar_lea.vmem [#allocation9], %s1382_s17 }
  0x66   : > { %1957 = dma.done.wait (%p2309_p5), %s485_s15, 64  }
  0x67   : > { %1959 = vsyncadd (%p2309_p5), %s485_s15, 4294967232  ;;  %s2649_s16 = sld [smem:[#allocation33_spill]] }
  0x68   : > { %s2650_s14 = sld [smem:[#allocation27_spill]] }
  0x6d   : > { %s494_s12 = sand.u32 1, %s2649_s16  }
  0x6e   : > { %s496_s23 = sand.u32 1, %s2650_s14   ;;  %s495_s10 = scalar_lea.sflag [#allocation13], %s494_s12 }
  0x6f   : > { %s2365_s18 = sshll.u32 %s496_s23, 2 }
  0x70   : > { %s498_s7 = scalar_lea.vmem [#allocation12], %s2365_s18 }
  0x71   : > { %1961 = dma.done.wait (%p2233_p12), %s495_s10, 128  }
  0x72   : > { %1963 = vsyncadd (%p2233_p12), %s495_s10, 4294967168  ;;  %s508_s8 = scalar_lea.vmem [#allocation14], %s2365_s18 }
  0x73   : > { %1965 = dma.done.wait (%p74_p1), [#allocation16], 512  }
  0x74   : > { %1967 = vsyncadd (%p74_p1), [#allocation16], 4294966784 }
  0x75   : > { %1969 = dma.done.wait (%p74_p1), [#allocation19], 512  }
  0x76   : > { %1971 = vsyncadd (%p74_p1), [#allocation19], 4294966784  ;;  %s1389_s1 = sshll.u32 %s2355_s3, 3  ;;  %s2652_s5 = sld [smem:[#allocation30_spill]] }
  0x77   : > { %s2382_s2 = scalar_lea.vmem [#allocation21], %s1389_s1 }
  0x7c   : > { %p1390_p3 = scmp.ne.s32.totalorder %s2652_s5, 0 }
  0x7d   : > { %s2653_s30 = sld [smem:[#allocation44_spill]] (!%p1390_p3)  ;;  %s2034_s21 = smov (!%p1390_p3), 104  }
  0x7e   : > { %582 = sbr.rel (%p1390_p3) target bundleno = 393 (0x189), region = 96  ;;  %s2035_s25 = smov (!%p1390_p3), 120  }
  0x7f   : > { %s2036_s17 = smov (!%p1390_p3), 112  }
  0x83   : > { %v1442_v0 = vld [vmem:[#allocation15 + $0x8] sm:$0xff]  ;;  %v1441_v1 = vld [vmem:[#allocation15] sm:$0xff]  ;;  %vm604_vm0 = vcmask 261120   ;;  %v1633_v3 = vld [vmem:[%s2653_s30] ss:$0 sm:$0xff]  ;;  %vm622_vm1 = vcmask 60416  }
  0x84   : > { %614 = vmatpush.bf16.msra.mxu0 %v1442_v0  ;;  %v583_v2 = vld [vmem:[%s488_s4] sm:$0xf]  ;;  %vm640_vm2 = vcmask 7168   ;;  %v2037_v8 = vmov -inf   ;;  %v2038_v9 = vmov 0.0   ;;  %vm649_vm3 = vcmask 64512  }
  0x85   : > { %641 = vst.msk [vmem:[#allocation5] sm:$0xff] %vm640_vm2, %v2037_v8 }
  0x86   : > { %642 = vst.msk [vmem:[#allocation5 + $0x8] sm:$0xff] %vm640_vm2, %v2037_v8 }
  0x87   : > { %643 = vst.msk [vmem:[#allocation5 + $0x10] sm:$0xff] %vm640_vm2, %v2037_v8 }
  0x88   : > { %615 = vmatpush.bf16.msra.mxu0 %v1441_v1  ;;  %644 = vst.msk [vmem:[#allocation5 + $0x18] sm:$0xff] %vm640_vm2, %v2037_v8 }
  0x89   : > { %645 = vst.msk [vmem:[#allocation6] sm:$0xff] %vm640_vm2, %v2038_v9 }
  0x8a   : > { %646 = vst.msk [vmem:[#allocation6 + $0x8] sm:$0xff] %vm640_vm2, %v2038_v9 }
  0x8b   : > { %1399 = vmatmul.msk.bf16.vlgmr.msra.gmra.mxu0 %vm604_vm0, %v583_v2  ;;  %647 = vst.msk [vmem:[#allocation6 + $0x10] sm:$0xff] %vm640_vm2, %v2038_v9 }
  0x8c   : > { %648 = vst.msk [vmem:[#allocation6 + $0x18] sm:$0xff] %vm640_vm2, %v2038_v9 }
  0x8d   : > { %650 = vst.msk [vmem:[#allocation7] sm:$0xff] %vm649_vm3, %v2038_v9 }
  0x8e   : > { %651 = vst.msk [vmem:[#allocation7 + $0x8] sm:$0xff] %vm649_vm3, %v2038_v9 }
  0x8f   : > { %652 = vst.msk [vmem:[#allocation7 + $0x10] sm:$0xff] %vm649_vm3, %v2038_v9 }
  0x90   : > { %653 = vst.msk [vmem:[#allocation7 + $0x18] sm:$0xff] %vm649_vm3, %v2038_v9 }
 0x108   : > { %v617_v4 = vpop.f32.mrf.mxu0 }
 0x109   : > { %v618_v5 = vadd.f32 %v1633_v3, %v617_v4 }
 0x10b   : > { %v621_v6 = vpack.c.bf16 %v618_v5, %v618_v5 }
 0x10d   : > { %635 = vrot.lane.b32.xlu1 %v621_v6, %s2034_s21  ;;  %625 = vrot.lane.b32.xlu0 %v621_v6, %s2035_s25  ;;  %623 = vst.msk [vmem:[#allocation2] sm:$0xf] %vm622_vm1, %v621_v6 }
 0x110   : > { %v619_v7 = vpop.f32.mrf.mxu0 }
 0x115   : > { %630 = vrot.lane.b32.xlu0 %v621_v6, %s2036_s17 }
 0x17f   : > { %v636_v10 = vpop.permute.xlu1 %635  ;;  %v626_v11 = vpop.permute.xlu0 %625 }
 0x180   : > { %639 = vst.msk [vmem:[#allocation2 + $0xc] sm:$0xf] %vm622_vm1, %v636_v10 }
 0x181   : > { %629 = vst.msk [vmem:[#allocation2 + $0x4] sm:$0xf] %vm622_vm1, %v626_v11 }
 0x187   : > { %v631_v12 = vpop.permute.xlu0 %630 }
 0x188   : > { %634 = vst.msk [vmem:[#allocation2 + $0x8] sm:$0xf] %vm622_vm1, %v631_v12 }
 0x189 PF: > { %v1444_v13 = vld [vmem:[#allocation17 + $0x8] sm:$0xff]  ;;  %v1443_v14 = vld [vmem:[#allocation17] sm:$0xff]  ;;  %vm675_vm4 = vcmask 261120   ;;  %v1446_v16 = vld [vmem:[#allocation18 + $0x8] sm:$0xff]  ;;  %s2654_s16 = sld [smem:[#allocation46_spill]]  ;;  %vm730_vm5 = vcmask 60416  }
 0x18a   : > { %685 = vmatpush.bf16.msra.mxu0 %v1444_v13  ;;  %v654_v15 = vld [vmem:[%s498_s7] sm:$0xf]  ;;  %722 = vmatpush.bf16.msra.mxu1 %v1446_v16  ;;  %v1445_v17 = vld [vmem:[#allocation18] sm:$0xff]  ;;  %s2039_s14 = smov 104   ;;  %s2040_s24 = smov 120   ;;  %vm774_vm6 = vcmask 64512  }
 0x18b   : > { %s2041_s12 = smov 112   ;;  %v766_v25 = vld [vmem:[#allocation2] sm:$0xf]  ;;  %v692_v26 = vld [vmem:[%s508_s8] sm:$0xf]  ;;  %s2655_s10 = sld [smem:[#allocation48_spill]] }
 0x18c   : > { %v769_v34 = vld [vmem:[#allocation2 + $0xc] sm:$0xf]  ;;  %v767_v35 = vld [vmem:[#allocation2 + $0x4] sm:$0xf]  ;;  %vm983_vm7 = vcmask 1043456   ;;  %v851_v57 = vld [vmem:[#allocation5] sm:$0xff] }
 0x18d   : > { %v2042_v60 = vmov 0   ;;  %vm939_vm8 = vcmask 7168   ;;  %v854_v63 = vld [vmem:[#allocation5 + $0x18] sm:$0xff]  ;;  %v853_v3 = vld [vmem:[#allocation5 + $0x10] sm:$0xff]  ;;  %s2656_s7 = sld [smem:[#allocation30_spill]] }
 0x18e   : > { %686 = vmatpush.bf16.msra.mxu0 %v1443_v14  ;;  %723 = vmatpush.bf16.msra.mxu1 %v1445_v17 }
 0x18f   : > { %v1637_v18 = vld [vmem:[%s2654_s16] ss:$0 sm:$0xff]  ;;  %v768_v38 = vld [vmem:[#allocation2 + $0x8] sm:$0xf]  ;;  %1634 = vset.pattern.permute.xlu2 %v2042_v60  ;;  %1635 = vset.pattern.permute.xlu1 %v2042_v60 }
 0x190   : > { %1636 = vset.pattern.permute.xlu0 %v2042_v60 }
 0x191   : > { %1408 = vmatmul.msk.bf16.vlgmr.msra.gmra.mxu0 %vm675_vm4, %v654_v15  ;;  %1417 = vmatmul.msk.bf16.vlgmr.msra.gmra.mxu1 %vm675_vm4, %v692_v26  ;;  %v1638_v42 = vld [vmem:[%s2655_s10] ss:$0 sm:$0xff] }
 0x193   : > { %p1426_p1 = scmp.ne.s32.totalorder %s2656_s7, 1 }
 0x194   : > { %s2044_s8 = smov (!%p1426_p1), 24   ;;  %s2045_s1 = smov (!%p1426_p1), 8  }
 0x195   : > { %s2046_s5 = smov (!%p1426_p1), 16   ;;  %s2657_s30 = sld [smem:[#allocation50_spill]] (!%p1426_p1) }
 0x20e   : > { %v688_v19 = vpop.f32.mrf.mxu0  ;;  %v725_v43 = vpop.f32.mrf.mxu1 }
 0x20f   : > { %v689_v20 = vadd.f32 %v1637_v18, %v688_v19  ;;  %v726_v44 = vadd.f32 %v1638_v42, %v725_v43  ;;  %v852_v19 = vld [vmem:[#allocation5 + $0x8] sm:$0xff] }
 0x211   : > { %v729_v21 = vpack.c.bf16 %v689_v20, %v689_v20  ;;  %v2423_v45 = vpack.c.bf16 %v726_v44, %v726_v44 }
 0x213   : > { %731 = vst.msk [vmem:[#allocation3] sm:$0xf] %vm730_vm5, %v729_v21  ;;  %756 = vrot.lane.b32.xlu1 %v729_v21, %s2039_s14  ;;  %735 = vrot.lane.b32.xlu0 %v729_v21, %s2040_s24 }
 0x214   : > { %733 = vst.msk [vmem:[#allocation4] sm:$0xf] %vm730_vm5, %v2423_v45 }
 0x216   : > { %v690_v22 = vpop.f32.mrf.mxu0  ;;  %v727_v46 = vpop.f32.mrf.mxu1 }
 0x21a   : > { %v770_v23 = vld [vmem:[#allocation3] sm:$0xf] }
 0x21b   : > { %746 = vrot.lane.b32.xlu0 %v729_v21, %s2041_s12  ;;  %v779_v24 = vsel %vm774_vm6, %v770_v23, 0  ;;  %v976_v49 = vld [vmem:[#allocation4] sm:$0xf] }
 0x21c   : > { %788 = vmatpush.bf16.xpose.msra.mxu2 %v779_v24  ;;  %v985_v50 = vsel %vm983_vm7, %v976_v49, 0 }
 0x223   : > { %1418 = vmatmul.msk.bf16.vlgmr.msra.gmra.mxu2 %vm774_vm6, %v766_v25 }
 0x224   : > { %994 = vmatpush.bf16.msrb.mxu2 %v985_v50 }
 0x285   : > { %v757_v27 = vpop.permute.xlu1 %756  ;;  %v736_v28 = vpop.permute.xlu0 %735 }
 0x286   : > { %760 = vst.msk [vmem:[#allocation3 + $0xc] sm:$0xf] %vm730_vm5, %v757_v27 }
 0x287   : > { %739 = vst.msk [vmem:[#allocation3 + $0x4] sm:$0xf] %vm730_vm5, %v736_v28 }
 0x28d   : > { %v747_v29 = vpop.permute.xlu0 %746  ;;  %v773_v30 = vld [vmem:[#allocation3 + $0xc] sm:$0xf] }
 0x28e   : > { %750 = vst.msk [vmem:[#allocation3 + $0x8] sm:$0xf] %vm730_vm5, %v747_v29  ;;  %v771_v31 = vld [vmem:[#allocation3 + $0x4] sm:$0xf]  ;;  %v836_v32 = vsel %vm774_vm6, %v773_v30, 0 }
 0x28f   : > { %v798_v33 = vsel %vm774_vm6, %v771_v31, 0  ;;  %845 = vmatpush.bf16.xpose.msrb.mxu1 %v836_v32 }
 0x290   : > { %807 = vmatpush.bf16.xpose.msra.mxu3 %v798_v33 }
 0x295   : > { %v772_v36 = vld [vmem:[#allocation3 + $0x8] sm:$0xf] }
 0x296   : > { %1421 = vmatmul.msk.bf16.vlgmr.msrb.gmra.mxu1 %vm774_vm6, %v769_v34  ;;  %v817_v37 = vsel %vm774_vm6, %v772_v36, 0 }
 0x297   : > { %826 = vmatpush.bf16.xpose.msrb.mxu0 %v817_v37  ;;  %1419 = vmatmul.msk.bf16.vlgmr.msra.gmra.mxu3 %vm774_vm6, %v767_v35 }
 0x29e   : > { %1420 = vmatmul.msk.bf16.vlgmr.msrb.gmra.mxu0 %vm774_vm6, %v768_v38 }
 0x2a6   : > { %v2416_v39 = vpop.f32.mrf.mxu2 }
 0x2a7   : > { %v855_v40 = vsel %vm774_vm6, %v2416_v39, -inf }
 0x2a8   : > { %856 = vmax.xlane.f32.xlu1 %v855_v40 }
 0x2ae   : > { %v792_v41 = vpop.f32.mrf.mxu2 }
 0x313   : > { %v2427_v47 = vpop.f32.mrf.mxu1 }
 0x314   : > { %v864_v48 = vsel %vm774_vm6, %v2427_v47, -inf }
 0x315   : > { %865 = vmax.xlane.f32.xlu0 %v864_v48 }
 0x31a   : > { %v2432_v51 = vpop.f32.mrf.mxu3 }
 0x31b   : > { %v2434_v52 = vpop.f32.mrf.mxu0  ;;  %v849_v53 = vpop.f32.mrf.mxu1  ;;  %v858_v62 = vsel %vm774_vm6, %v2432_v51, -inf }
 0x31c   : > { %v861_v54 = vsel %vm774_vm6, %v2434_v52, -inf  ;;  %v857_v58 = vpop.xlane.xlu1 %856 }
 0x31d   : > { %862 = vmax.xlane.f32.xlu2 %v861_v54  ;;  %v867_v59 = vmax.f32 %v851_v57, %v857_v58  ;;  %v915_v58 = vld [vmem:[#allocation6] sm:$0xff] }
 0x31f   : > { %v871_v61 = vsub.f32 %v851_v57, %v867_v59  ;;  %1065 = vst.msk [vmem:[#allocation5] sm:$0xff] %vm939_vm8, %v867_v59 }
 0x321   : > { %v875_v2 = vmul.f32 1.442695, %v871_v61 }
 0x322   : > { %v811_v55 = vpop.f32.mrf.mxu3 }
 0x323   : > { %v830_v56 = vpop.f32.mrf.mxu0  ;;  %1639 = vpow2.f32 %v875_v2 }
 0x329   : > { %751 = vrot.lane.b32.xlu0 %v2423_v45, %s2041_s12  ;;  %v2447_v7 = vpop.eup %1639 }
 0x32a   : > { %v919_v60 = vmul.f32 %v2447_v7, %v915_v58 }
 0x335   : > { %741 = vrot.lane.b32.xlu2 %v2423_v45, %s2040_s24 }
 0x35e   : > { %859 = vmax.xlane.f32.xlu2 %v858_v62 }
 0x376   : > { %885 = vperm.xlu2 %1634, %v867_v59  }
 0x388   : > { %v866_v0 = vpop.xlane.xlu0 %865 }
 0x389   : > { %v870_v1 = vmax.f32 %v854_v63, %v866_v0 }
 0x38b   : > { %1068 = vst.msk [vmem:[#allocation5 + $0x18] sm:$0xff] %vm939_vm8, %v870_v1  ;;  %900 = vperm.xlu2 %1634, %v870_v1   ;;  %v874_v10 = vsub.f32 %v854_v63, %v870_v1  ;;  %v918_v63 = vld [vmem:[#allocation6 + $0x18] sm:$0xff] }
 0x38d   : > { %v881_v12 = vmul.f32 1.442695, %v874_v10 }
 0x390   : > { %v863_v4 = vpop.xlane.xlu2 %862 }
 0x391   : > { %v869_v5 = vmax.f32 %v853_v3, %v863_v4  ;;  %v917_v4 = vld [vmem:[#allocation6 + $0x10] sm:$0xff] }
 0x393   : > { %1067 = vst.msk [vmem:[#allocation5 + $0x10] sm:$0xff] %vm939_vm8, %v869_v5  ;;  %895 = vperm.xlu1 %1635, %v869_v5   ;;  %v873_v6 = vsub.f32 %v853_v3, %v869_v5 }
 0x395   : > { %v879_v8 = vmul.f32 1.442695, %v873_v6 }
 0x397   : > { %1641 = vpow2.f32 %v879_v8 }
 0x398   : > { %v742_v9 = vpop.permute.xlu2 %741  ;;  %1643 = vpow2.f32 %v881_v12 }
 0x399   : > { %745 = vst.msk [vmem:[#allocation4 + $0x4] sm:$0xf] %vm730_vm5, %v742_v9 }
 0x39b   : > { %950 = vperm.xlu1 %1635, %v2447_v7   ;;  %v752_v11 = vpop.permute.xlu0 %751  ;;  %v946_v7 = vld [vmem:[#allocation7 + $0x10] sm:$0xff] }
 0x39c   : > { %755 = vst.msk [vmem:[#allocation4 + $0x8] sm:$0xf] %vm730_vm5, %v752_v11 }
 0x39d   : > { %v2453_v15 = vpop.eup %1641 }
 0x39e   : > { %v2457_v18 = vpop.eup %1643  ;;  %v921_v5 = vmul.f32 %v2453_v15, %v917_v4 }
 0x39f   : > { %v922_v1 = vmul.f32 %v2457_v18, %v918_v63 }
 0x3a0   : > { %v977_v13 = vld [vmem:[#allocation4 + $0x4] sm:$0xf] }
 0x3a1   : > { %v1004_v14 = vsel %vm983_vm7, %v977_v13, 0 }
 0x3a2   : > { %1013 = vmatpush.bf16.msrb.mxu3 %v1004_v14  ;;  %v916_v14 = vld [vmem:[#allocation6 + $0x8] sm:$0xff] }
 0x3a3   : > { %960 = vperm.xlu1 %1635, %v2453_v15   ;;  %v978_v16 = vld [vmem:[#allocation4 + $0x8] sm:$0xf]  ;;  %v945_v15 = vld [vmem:[#allocation7 + $0x8] sm:$0xff] }
 0x3a4   : > { %v1023_v17 = vsel %vm983_vm7, %v978_v16, 0 }
 0x3a5   : > { %1032 = vmatpush.bf16.msra.mxu0 %v1023_v17 }
 0x3ab   : > { %965 = vperm.xlu1 %1635, %v2457_v18  }
 0x3d1   : > { %v860_v20 = vpop.xlane.xlu2 %859 }
 0x3d2   : > { %v868_v21 = vmax.f32 %v852_v19, %v860_v20 }
 0x3d4   : > { %v872_v22 = vsub.f32 %v852_v19, %v868_v21  ;;  %1066 = vst.msk [vmem:[#allocation5 + $0x8] sm:$0xff] %vm939_vm8, %v868_v21  ;;  %890 = vperm.xlu2 %1634, %v868_v21   ;;  %v947_v19 = vld [vmem:[#allocation7 + $0x18] sm:$0xff] }
 0x3d6   : > { %v877_v23 = vmul.f32 1.442695, %v872_v22 }
 0x3d8   : > { %1645 = vpow2.f32 %v877_v23 }
 0x3d9   : > { %v886_v24 = vpop.permute.xlu2 %885 }
 0x3da   : > { %v903_v25 = vsub.f32 %v2416_v39, %v886_v24 }
 0x3dc   : > { %v907_v26 = vmul.f32 1.442695, %v903_v25  ;;  %761 = vrot.lane.b32.xlu2 %v2423_v45, %s2039_s14 }
 0x3de   : > { %v2464_v27 = vpop.eup %1645  ;;  %1647 = vpow2.f32 %v907_v26 }
 0x3df   : > { %955 = vperm.xlu0 %1636, %v2464_v27   ;;  %v920_v16 = vmul.f32 %v2464_v27, %v916_v14 }
 0x3e4   : > { %v1648_v28 = vpop.eup %1647 }
 0x3e5   : > { %v972_v29 = vpack.c.bf16 %v1648_v28, %v1648_v28  ;;  %v901_v30 = vpop.permute.xlu2 %900  ;;  %v923_v33 = vsel %vm774_vm6, %v1648_v28, 0.0 }
 0x3e6   : > { %v906_v31 = vsub.f32 %v2427_v47, %v901_v30 }
 0x3e7   : > { %1422 = vmatmul.msk.bf16.vlgmr.msrb.gmra.mxu2 %vm774_vm6, %v972_v29 }
 0x3e8   : > { %v913_v32 = vmul.f32 1.442695, %v906_v31 }
 0x3ea   : > { %1649 = vpow2.f32 %v913_v32 }
 0x3f0   : > { %v1650_v37 = vpop.eup %1649 }
 0x3f1   : > { %v932_v38 = vsel %vm774_vm6, %v1650_v37, 0.0 }
 0x405   : > { %924 = vadd.xlane.f32.xlu2 %v923_v33  ;;  %v896_v34 = vpop.permute.xlu1 %895 }
 0x406   : > { %v905_v35 = vsub.f32 %v2434_v52, %v896_v34  ;;  %v975_v52 = vpack.c.bf16 %v1650_v37, %v1650_v37 }
 0x408   : > { %v911_v36 = vmul.f32 1.442695, %v905_v35 }
 0x40a   : > { %1651 = vpow2.f32 %v911_v36 }
 0x40d   : > { %933 = vadd.xlane.f32.xlu2 %v932_v38  ;;  %v951_v53 = vpop.permute.xlu1 %950 }
 0x410   : > { %v1652_v39 = vpop.eup %1651 }
 0x411   : > { %v974_v40 = vpack.c.bf16 %v1652_v39, %v1652_v39  ;;  %v929_v41 = vsel %vm774_vm6, %v1652_v39, 0.0 }
 0x412   : > { %930 = vadd.xlane.f32.xlu1 %v929_v41 }
 0x413   : > { %1424 = vmatmul.msk.bf16.vlgmr.msra.gmra.mxu0 %vm774_vm6, %v974_v40 }
 0x415   : > { %v961_v59 = vpop.permute.xlu1 %960 }
 0x416   : > { %v970_v9 = vmul.f32 %v961_v59, %v946_v7 }
 0x41d   : > { %v966_v0 = vpop.permute.xlu1 %965 }
 0x41e   : > { %v971_v21 = vmul.f32 %v966_v0, %v947_v19 }
 0x42e   : > { %v891_v42 = vpop.permute.xlu2 %890 }
 0x42f   : > { %v904_v43 = vsub.f32 %v2432_v51, %v891_v42  ;;  %v944_v51 = vld [vmem:[#allocation7] sm:$0xff] }
 0x430   : > { %v968_v54 = vmul.f32 %v951_v53, %v944_v51 }
 0x431   : > { %v909_v44 = vmul.f32 1.442695, %v904_v43 }
 0x433   : > { %1653 = vpow2.f32 %v909_v44 }
 0x436   : > { %v762_v45 = vpop.permute.xlu2 %761 }
 0x437   : > { %765 = vst.msk [vmem:[#allocation4 + $0xc] sm:$0xf] %vm730_vm5, %v762_v45 }
 0x439   : > { %v1654_v46 = vpop.eup %1653 }
 0x43a   : > { %v926_v47 = vsel %vm774_vm6, %v1654_v46, 0.0  ;;  %v973_v48 = vpack.c.bf16 %v1654_v46, %v1654_v46 }
 0x43b   : > { %927 = vadd.xlane.f32.xlu0 %v926_v47 }
 0x43c   : > { %1423 = vmatmul.msk.bf16.vlgmr.msrb.gmra.mxu3 %vm774_vm6, %v973_v48 }
 0x43e   : > { %v979_v49 = vld [vmem:[#allocation4 + $0xc] sm:$0xf] }
 0x43f   : > { %v1042_v50 = vsel %vm983_vm7, %v979_v49, 0 }
 0x440   : > { %1051 = vmatpush.bf16.msra.mxu1 %v1042_v50 }
 0x443   : > { %1425 = vmatmul.msk.bf16.vlgmr.msra.gmra.mxu1 %vm774_vm6, %v975_v52 }
 0x451   : > { %v956_v13 = vpop.permute.xlu0 %955 }
 0x452   : > { %v969_v20 = vmul.f32 %v956_v13, %v945_v15 }
 0x46a   : > { %v996_v55 = vpop.f32.mrf.mxu2 }
 0x46b   : > { %v1057_v56 = vadd.f32 %v996_v55, %v968_v54 }
 0x46d   : > { %1061 = vst.msk [vmem:[#allocation7] sm:$0xff] %vm774_vm6, %v1057_v56 }
 0x472   : > { %v998_v57 = vpop.f32.mrf.mxu2 }
 0x478   : > { %v925_v61 = vpop.xlane.xlu2 %924 }
 0x479   : > { %v935_v62 = vadd.f32 %v925_v61, %v919_v60 }
 0x47b   : > { %940 = vst.msk [vmem:[#allocation6] sm:$0xff] %vm939_vm8, %v935_v62 }
 0x480   : > { %v934_v2 = vpop.xlane.xlu2 %933 }
 0x481   : > { %v938_v3 = vadd.f32 %v934_v2, %v922_v1 }
 0x483   : > { %943 = vst.msk [vmem:[#allocation6 + $0x18] sm:$0xff] %vm939_vm8, %v938_v3 }
 0x485   : > { %v931_v6 = vpop.xlane.xlu1 %930 }
 0x486   : > { %v937_v8 = vadd.f32 %v931_v6, %v921_v5 }
 0x488   : > { %942 = vst.msk [vmem:[#allocation6 + $0x10] sm:$0xff] %vm939_vm8, %v937_v8 }
 0x490   : > { %v1034_v10 = vpop.f32.mrf.mxu0 }
 0x491   : > { %v1059_v11 = vadd.f32 %v1034_v10, %v970_v9 }
 0x493   : > { %1063 = vst.msk [vmem:[#allocation7 + $0x10] sm:$0xff] %vm774_vm6, %v1059_v11 }
 0x498   : > { %v1036_v12 = vpop.f32.mrf.mxu0 }
 0x4ae   : > { %v928_v17 = vpop.xlane.xlu0 %927 }
 0x4af   : > { %v936_v18 = vadd.f32 %v928_v17, %v920_v16 }
 0x4b1   : > { %941 = vst.msk [vmem:[#allocation6 + $0x8] sm:$0xff] %vm939_vm8, %v936_v18 }
 0x4bf   : > { %v1015_v22 = vpop.f32.mrf.mxu3 }
 0x4c0   : > { %v1058_v23 = vadd.f32 %v1015_v22, %v969_v20  ;;  %v1053_v24 = vpop.f32.mrf.mxu1 }
 0x4c1   : > { %v1060_v25 = vadd.f32 %v1053_v24, %v971_v21 }
 0x4c2   : > { %1062 = vst.msk [vmem:[#allocation7 + $0x8] sm:$0xff] %vm774_vm6, %v1058_v23 }
 0x4c3   : > { %1064 = vst.msk [vmem:[#allocation7 + $0x18] sm:$0xff] %vm774_vm6, %v1060_v25 }
 0x4c4   : > { %1072 = sbr.rel (%p1426_p1) target bundleno = 1609 (0x649), region = 100 }
 0x4c7   : > { %v1017_v26 = vpop.f32.mrf.mxu3 }
 0x4c8   : > { %v1055_v28 = vpop.f32.mrf.mxu1 }
 0x4c9   : > { %v1076_v27 = vld [vmem:[#allocation6 + $0x18] sm:$0xff]  ;;  %v1074_v29 = vld [vmem:[#allocation6 + $0x8] sm:$0xff]  ;;  %v2043_v30 = vmov 0   ;;  %v1073_v31 = vld [vmem:[#allocation6] sm:$0xff]  ;;  %vm1116_vm9 = vcmask 126016   ;;  %vm1123_vm10 = vcmask 191616  }
 0x4ca   : > { %1656 = vset.pattern.permute.xlu1 %v2043_v30  ;;  %1658 = vrcp.f32 %v1076_v27  ;;  %1655 = vset.pattern.permute.xlu0 %v2043_v30  ;;  %v1075_v32 = vld [vmem:[#allocation6 + $0x10] sm:$0xff]  ;;  %v1084_v37 = vld [vmem:[#allocation7 + $0x18] sm:$0xff]  ;;  %v1082_v38 = vld [vmem:[#allocation7 + $0x8] sm:$0xff]  ;;  %vm1130_vm11 = vcmask 257216  }
 0x4cb   : > { %1660 = vrcp.f32 %v1074_v29  ;;  %v1081_v45 = vld [vmem:[#allocation7] sm:$0xff]  ;;  %v1083_v46 = vld [vmem:[#allocation7 + $0x10] sm:$0xff] }
 0x4cc   : > { %1662 = vrcp.f32 %v1073_v31  ;;  %v1448_v53 = vld [vmem:[#allocation20 + $0x8] sm:$0xff]  ;;  %v1447_v54 = vld [vmem:[#allocation20] sm:$0xff] }
 0x4cd   : > { %1664 = vrcp.f32 %v1075_v32  ;;  %1162 = vmatpush.bf16.msra.mxu0 %v1448_v53  ;;  %v1657_v59 = vld [vmem:[%s2657_s30] ss:$0 sm:$0xff] }
 0x4d0   : > { %v1659_v33 = vpop.eup %1658 }
 0x4d1   : > { %v1661_v34 = vpop.eup %1660  ;;  %1102 = vperm.xlu1 %1656, %v1659_v33   ;;  %1163 = vmatpush.bf16.msra.mxu0 %v1447_v54 }
 0x4d2   : > { %1092 = vperm.xlu0 %1655, %v1661_v34   ;;  %v1663_v35 = vpop.eup %1662 }
 0x4d3   : > { %v1665_v36 = vpop.eup %1664 }
 0x4d9   : > { %1087 = vperm.xlu1 %1656, %v1663_v35  }
 0x4da   : > { %1097 = vperm.xlu0 %1655, %v1665_v36  }
 0x543   : > { %v1103_v39 = vpop.permute.xlu1 %1102 }
 0x544   : > { %v1108_v40 = vmul.f32 %v1103_v39, %v1084_v37  ;;  %v1093_v41 = vpop.permute.xlu0 %1092 }
 0x545   : > { %v1106_v42 = vmul.f32 %v1093_v41, %v1082_v38 }
 0x546   : > { %v1125_v43 = vpack.c.bf16 %v1108_v40, %v1108_v40 }
 0x547   : > { %v1111_v44 = vpack.c.bf16 %v1106_v42, %v1106_v42 }
 0x548   : > { %1127 = vrot.lane.b32.xlu0 %v1125_v43, %s2044_s8 }
 0x549   : > { %1113 = vrot.lane.b32.xlu2 %v1111_v44, %s2045_s1 }
 0x54b   : > { %v1088_v47 = vpop.permute.xlu1 %1087 }
 0x54c   : > { %v1105_v48 = vmul.f32 %v1088_v47, %v1081_v45  ;;  %v1098_v49 = vpop.permute.xlu0 %1097 }
 0x54d   : > { %v1107_v50 = vmul.f32 %v1098_v49, %v1083_v46 }
 0x54e   : > { %v1109_v52 = vpack.c.bf16 %v1105_v48, %v1105_v48 }
 0x54f   : > { %v1118_v51 = vpack.c.bf16 %v1107_v50, %v1107_v50 }
 0x550   : > { %1110 = vst.msk [vmem:[#allocation8] sm:$0xf] %vm730_vm5, %v1109_v52 }
 0x551   : > { %1120 = vrot.lane.b32.xlu2 %v1118_v51, %s2046_s5 }
 0x5a3   : > { %v1114_v55 = vpop.permute.xlu2 %1113 }
 0x5a4   : > { %1117 = vst.msk [vmem:[#allocation8] sm:$0xf] %vm1116_vm9, %v1114_v55 }
 0x5ab   : > { %v1121_v56 = vpop.permute.xlu2 %1120 }
 0x5ac   : > { %1124 = vst.msk [vmem:[#allocation8] sm:$0xf] %vm1123_vm10, %v1121_v56 }
 0x5ba   : > { %v1128_v57 = vpop.permute.xlu0 %1127 }
 0x5bb   : > { %1131 = vst.msk [vmem:[#allocation8] sm:$0xf] %vm1130_vm11, %v1128_v57 }
 0x5c2   : > { %v1132_v58 = vld [vmem:[#allocation8] sm:$0xf] }
 0x5c3   : > { %1435 = vmatmul.msk.bf16.vlgmr.msra.gmra.mxu0 %vm675_vm4, %v1132_v58 }
 0x640   : > { %v1165_v60 = vpop.f32.mrf.mxu0 }
 0x641   : > { %v1166_v61 = vadd.f32 %v1657_v59, %v1165_v60 }
 0x643   : > { %1169 = vst.msk [vmem:[%s2382_s2] sm:$0xff] %vm675_vm4, %v1166_v61 }
 0x648   : > { %v1167_v62 = vpop.f32.mrf.mxu0 }
 0x649 PF: > { %s2658_s21 = sld [smem:[#allocation32_spill]]  ;;  %s1185_s16 = sshll.u32 %s2382_s2, 4  ;;  %s1186_s16 = int_to_ptr.vmem [resolvable:$true] %s1185_s16 }
 0x64a   : > { %s2659_s25 = sld [smem:[#allocation31_spill]]  ;;  %s1171_s8 = scalar_lea.sflag [#allocation11], %s2355_s3 }
 0x64b   : > { %s2661_s23 = sld [smem:[#allocation51_spill]] }
 0x64f   : > { %s1437_s15 = sshll.u32 %s2658_s21, 1 }
 0x650   : > { %s1181_s4 = sadd.s32 %s2659_s25, %s1437_s15 }
 0x651   : > { %s1438_s14 = sshll.u32 %s1181_s4, 3  ;;  %s2662_s10 = smov %s2661_s23 }
 0x652   : > { %s1183_s18 = scalar_lea.hbm %s2661_s23, %s1438_s14  ;;  %s1896_s2 = scalar_lea.hbm %s2662_s10, 32 }
 0x653   : > { %s1187_s7 = sshll.u32 %s1183_s18, 4  ;;  %s1188_s7 = int_to_ptr.hbm [resolvable:$true] %s1187_s7 }
 0x654   : > { %s1890_s1 = sshra.s32 %s1188_s7, 4  ;;  %s1891_s1 = int_to_ptr.hbm [resolvable:$true] %s1890_s1 }
 0x655   : > { %s1892_s5 = scalar_lea.hbm %s1891_s1, 8  ;;  %p1897_p8 = scmp.lt.s32.totalorder %s1891_s1, %s2662_s10 }
 0x656   : > { %p1893_p11 = scmp.ne.s32.totalorder %s1891_s1, %s1892_s5  ;;  %p1898_p5 = scmp.lt.s32.totalorder %s1896_s2, %s1892_s5 }
 0x658   : > { %p1894_p12 = pnand %p1893_p11, %p2313_p7  ;;  %p1899_p6 = por %p1898_p5, %p1897_p8 }
 0x65a   : > { %p1895_p13 = pneg %p1894_p12 }
 0x65c   : > { %p1900_p10 = pnand %p1899_p6, %p1895_p13 }
 0x65e   : > { %1903 = shalt.err (!%p1900_p10)
}
 0x65f   : > { %1471 = dma.vmem_to_hbm [thread:$0]  (%p2313_p7), %s1186_s16, 128, %s1188_s7, %s1171_s8  }
 0x660 PF: > { %s2663_s3 = sld [smem:[#allocation28_spill]]  ;;  %p1509_p0 = scmp.ge.s32.totalorder %s2026_s29, 2 }
 0x662   : > { %p1497_p9 = pnand %p1509_p0, %p2320_p2 }
 0x664   : > { %p1498_p4 = pneg %p1497_p9 }
 0x666   : > { %s1199_s15 = sand.u32 1, %s2663_s3  }
 0x667   : > { %s1200_s4 = scalar_lea.sflag [#allocation11], %s1199_s15 }
 0x668   : > { %1973 = dma.done.wait (%p1498_p4), %s1200_s4, 128  }
 0x669   : > { %1975 = vsyncadd (%p1498_p4), %s1200_s4, 4294967168  ;;  %s32_s29 = sadd.s32 1, %s2026_s29   ;;  %s2666_s17 = sld [smem:[#allocation27_spill]] }
 0x66a   : > { %p2522_p3 = scmp.ge.s32.totalorder %s32_s29, 10   ;;  %s2667_s20 = sld [smem:[#allocation29_spill]] }
 0x66b   : > { %s2668_s16 = sld [smem:[#allocation36_spill]]  ;;  %s2670_s18 = smov %s1986_s19 }
 0x66c   : > { %s2669_s12 = sld [smem:[#allocation39_spill]]  ;;  %s2671_s19 = smov %s2338_s6 }
 0x66d   : > { %s2672_s21 = smov %s1998_s22  ;;  %s2673_s22 = smov %s2333_s11 }
 0x66e   : > { %s2674_s23 = smov %s2014_s26  ;;  %s2675_s24 = smov %s2018_s27 }
 0x66f   : > { %s2676_s25 = smov %s2022_s28  ;;  %s2677_s26 = smov %s2681_s13 }
 0x670   :  { %31 = sbr.rel (!%p2522_p3) target bundleno = 26 (0x1a), region = 166 }
 0x671   : > { %s2678_s27 = smov %s2668_s16 }
 0x672   : > { %s2679_s28 = smov %s2669_s12 }
 0x675   :  { %1206 = vsyncpa [#allocation10], 1 }
 0x676   :  { %1208 = vsyncpa [#allocation10 + $0x1], 1 }
 0x677   :  { %1209 = vsyncpa [#allocation13], 1 }
 0x678   :  { %1211 = vsyncpa [#allocation13 + $0x1], 1 }
 0x679   :  { %1212 = vsyncpa [#allocation16], 1 }
 0x67a   :  { %1213 = vsyncpa [#allocation19], 1 }
 0x67b   :  { %1214 = vsyncpa [#allocation11], 1 }
 0x67c   :  { %1216 = vsyncpa [#allocation11 + $0x1], 1 }

</bundles_post_ra>
